<compile_context>
chip_gen: v7x
topology: tpu7x:2x2x1
jax: 0.10.0
libtpu: 0.0.40
codegen_flags: <defaults>
</compile_context>

<pallas_src>
import functools
import math

import jax
import jax.numpy as jnp
from jax.experimental import pallas as pl
from jax.experimental.pallas import tpu as pltpu


# ----------------------------------------------------------------------------
# helpers
# ----------------------------------------------------------------------------
def _round_up(x, m):
    return ((x + m - 1) // m) * m


def _pair(v):
    if isinstance(v, (tuple, list)):
        return (int(v[0]), int(v[1]))
    return (int(v), int(v))


def _vmem_capacity_bytes():
    """Physical VMEM of the attached TPU; conservative default if unknown."""
    try:
        info = pltpu.get_tpu_info()
        cap = int(getattr(info, "vmem_capacity_bytes", 0))
        if cap > 0:
            return cap
    except Exception:
        pass
    return 64 * 1024 * 1024  # v7x-sized conservative default


# ----------------------------------------------------------------------------
# Fast path: direct conv (stride == 1), taps folded into the reduction
# ----------------------------------------------------------------------------
def _make_direct_kernel(tap_offsets, m_rows):
    n_taps = len(tap_offsets)

    def kernel(x_ref, w_ref, b_ref, o_ref):
        # x_ref : [P, C]        bf16 flattened padded image (read once, resident)
        # w_ref : [T, C, O_pad] bf16 fully VMEM-resident weight
        # b_ref : [1, O_pad]    f32 bias
        # o_ref : [M, O_pad]    "wide" output rows for this image
        acc = jnp.dot(x_ref[pl.ds(tap_offsets[0], m_rows), :], w_ref[0],
                      preferred_element_type=jnp.float32)
        for t in range(1, n_taps):
            acc = acc + jnp.dot(x_ref[pl.ds(tap_offsets[t], m_rows), :], w_ref[t],
                                preferred_element_type=jnp.float32)
        o_ref[...] = (acc + b_ref[...]).astype(o_ref.dtype)

    return kernel


def _direct_footprint_bytes(N, C, H, W, O, KH, KW, padding, dilation):
    ph, pw = padding
    dh, dw = dilation
    HP, WP = H + 2 * ph, W + 2 * pw
    OH, OW = HP - dh * (KH - 1), WP - dw * (KW - 1)
    if OH <= 0 or OW <= 0:
        return 1 << 62
    extra = 1 if (KW - 1) * dw > 0 else 0
    P = (HP + extra) * WP
    M = OH * WP
    T = KH * KW
    O_pad = _round_up(O, 128)
    C_lane = _round_up(C, 128)          # internal lane padding of small C
    foot = (2 * _round_up(P, 16) * C_lane * 2        # input slab, double-buffered bf16
            + 2 * T * _round_up(C, 16) * O_pad * 2   # resident weight (x2 buffers)
            + 2 * 8 * O_pad * 4                      # bias
            + 2 * M * O_pad * 4                      # output block, double-buffered f32
            + M * O_pad * 4                          # f32 accumulator value
            + M * C_lane * 2                         # one sliced LHS tap value
            + (2 << 20))                             # slack
    return foot


def _direct_conv(x_nchw, weight_oihw, bias, padding, dilation, vmem_limit):
    N, C, H, W = x_nchw.shape
    O, _, KH, KW = weight_oihw.shape
    ph, pw = padding
    dh, dw = dilation
    HP, WP = H + 2 * ph, W + 2 * pw
    OH, OW = HP - dh * (KH - 1), WP - dw * (KW - 1)
    extra = 1 if (KW - 1) * dw > 0 else 0   # tail rows so the last tap window stays in bounds
    P = (HP + extra) * WP
    M = OH * WP                              # "wide" output rows; cols >= OW are discarded
    T = KH * KW
    O_pad = _round_up(O, 128)

    # Wrapper layout glue (cheap, input-sized): NCHW -> NHWC, cast bf16, pad, flatten.
    x = jnp.transpose(x_nchw, (0, 2, 3, 1)).astype(jnp.bfloat16)
    x = jnp.pad(x, ((0, 0), (ph, ph + extra), (pw, pw), (0, 0)))
    x = x.reshape(N, P, C)

    # Weight: OIHW -> [T = kh*KW + kw, C, O], bf16, O padded to lane width.
    w = jnp.transpose(weight_oihw, (2, 3, 1, 0)).reshape(T, C, O).astype(jnp.bfloat16)
    w = jnp.pad(w, ((0, 0), (0, 0), (0, O_pad - O)))
    b = bias.astype(jnp.float32) if bias is not None else jnp.zeros((O,), jnp.float32)
    b = jnp.pad(b, (0, O_pad - O)).reshape(1, O_pad)

    # out_wide[n, oh*WP + w', :] = sum_t x_flat[n, oh*WP + w' + off_t, :] @ W_t
    tap_offsets = tuple(kh * dh * WP + kw * dw
                        for kh in range(KH) for kw in range(KW))
    kernel = _make_direct_kernel(tap_offsets, M)

    out_wide = pl.pallas_call(
        kernel,
        out_shape=jax.ShapeDtypeStruct((N, M, O_pad), x_nchw.dtype),
        grid_spec=pltpu.PrefetchScalarGridSpec(
            num_scalar_prefetch=0,
            grid=(N,),
            in_specs=[
                pl.BlockSpec((None, P, C), lambda n: (n, 0, 0)),     # per-image slab
                pl.BlockSpec((T, C, O_pad), lambda n: (0, 0, 0)),    # resident weight
                pl.BlockSpec((1, O_pad), lambda n: (0, 0)),          # bias
            ],
            out_specs=pl.BlockSpec((None, M, O_pad), lambda n: (n, 0, 0)),
        ),
        compiler_params=pltpu.CompilerParams(
            dimension_semantics=("parallel",),
            vmem_limit_bytes=int(vmem_limit),
        ),
    )(x, w, b)

    out = out_wide.reshape(N, OH, WP, O_pad)[:, :, :OW, :O]
    return jnp.transpose(out, (0, 3, 1, 2))


# ----------------------------------------------------------------------------
# General path: im2col GEMM (stride > 1 / footprint too large for fast path)
# ----------------------------------------------------------------------------
def _gemm_bias_kernel(a_ref, w_ref, b_ref, o_ref, acc_ref):
    k = pl.program_id(2)
    contrib = jnp.dot(a_ref[...], w_ref[...], preferred_element_type=jnp.float32)

    @pl.when(k == 0)
    def _init():
        acc_ref[...] = contrib                    # no prior read / broadcast init

    @pl.when(k > 0)
    def _accum():
        acc_ref[...] += contrib

    @pl.when(k == pl.num_programs(2) - 1)
    def _store():
        o_ref[...] = (acc_ref[...] + b_ref[...]).astype(o_ref.dtype)


def _pick_fallback_tiles(M, K_pad, O_pad, budget_bytes):
    """Prefer whole-K (resident weight) and large lane-dense tiles within budget."""
    tk_cands = [t for t in (K_pad, 2048, 1024, 512, 256, 128)
                if t <= K_pad and K_pad % t == 0]
    tn_cands = [t for t in (O_pad, 512, 256, 128)
                if t <= O_pad and O_pad % t == 0]
    tm_cands = (512, 256, 128, 64, 32, 16)

    def footprint(tm, tk, tn):
        lhs = 2 * tm * tk * 2        # bf16, double-buffered
        rhs = 2 * tk * tn * 2        # bf16, double-buffered
        out = 2 * tm * tn * 4        # f32 output block, double-buffered
        acc = tm * tn * 4            # f32 accumulator scratch
        bia = 2 * _round_up(tn, 128) * 4
        return lhs + rhs + out + acc + bia + (1 << 20)

    for tk in tk_cands:
        for tn in tn_cands:
            for tm in tm_cands:
                if footprint(tm, tk, tn) <= budget_bytes:
                    return tm, tk, tn
    return 16, 128, 128


def _im2col_gemm_conv(x_nchw, weight_oihw, bias, stride, padding, dilation,
                      vmem_limit, budget):
    N, C, H, W = x_nchw.shape
    O, _, KH, KW = weight_oihw.shape
    sh, sw = stride
    ph, pw = padding
    dh, dw = dilation
    OH = (H + 2 * ph - dh * (KH - 1) - 1) // sh + 1
    OW = (W + 2 * pw - dw * (KW - 1) - 1) // sw + 1

    x = jnp.transpose(x_nchw, (0, 2, 3, 1)).astype(jnp.bfloat16)
    x = jnp.pad(x, ((0, 0), (ph, ph), (pw, pw), (0, 0)))
    patches = []
    for kh in range(KH):
        for kw in range(KW):
            h0, w0 = kh * dh, kw * dw
            h1 = h0 + (OH - 1) * sh + 1
            w1 = w0 + (OW - 1) * sw + 1
            patches.append(x[:, h0:h1:sh, w0:w1:sw, :])
    lhs = jnp.concatenate(patches, axis=-1).reshape(N * OH * OW, KH * KW * C)
    rhs = jnp.transpose(weight_oihw, (2, 3, 1, 0)).reshape(KH * KW * C, O)
    rhs = rhs.astype(jnp.bfloat16)
    b = bias.astype(jnp.float32) if bias is not None else jnp.zeros((O,), jnp.float32)

    M = N * OH * OW
    K = KH * KW * C
    K_pad = _round_up(K, 128)
    O_pad = _round_up(O, 128)
    tm, tk, tn = _pick_fallback_tiles(M, K_pad, O_pad, budget)
    M_pad = _round_up(M, tm)

    lhs = jnp.pad(lhs, ((0, M_pad - M), (0, K_pad - K)))
    rhs = jnp.pad(rhs, ((0, K_pad - K), (0, O_pad - O)))
    b = jnp.pad(b, (0, O_pad - O)).reshape(1, O_pad)

    grid = (M_pad // tm, O_pad // tn, K_pad // tk)

    out = pl.pallas_call(
        _gemm_bias_kernel,
        out_shape=jax.ShapeDtypeStruct((M_pad, O_pad), x_nchw.dtype),
        grid_spec=pltpu.PrefetchScalarGridSpec(
            num_scalar_prefetch=0,
            grid=grid,
            in_specs=[
                pl.BlockSpec((tm, tk), lambda i, j, k: (i, k)),   # patches
                pl.BlockSpec((tk, tn), lambda i, j, k: (k, j)),   # weight
                pl.BlockSpec((1, tn), lambda i, j, k: (0, j)),    # bias
            ],
            out_specs=pl.BlockSpec((tm, tn), lambda i, j, k: (i, j)),
            scratch_shapes=[pltpu.VMEM((tm, tn), jnp.float32)],
        ),
        compiler_params=pltpu.CompilerParams(
            dimension_semantics=("parallel", "parallel", "arbitrary"),
            vmem_limit_bytes=int(vmem_limit),
        ),
    )(lhs, rhs, b)

    out = out[:M, :O].reshape(N, OH, OW, O)
    return jnp.transpose(out, (0, 3, 1, 2))


# ----------------------------------------------------------------------------
# Public forward
# ----------------------------------------------------------------------------
def resconv2d_forward(x_nchw, weight_oihw, bias=None,
                      stride=(1, 1), padding=(0, 0), dilation=(1, 1),
                      groups=1, prefer_direct=True):
    """Forward of ReSConv2d: F.conv2d(x, weight, bias, stride, padding, dilation)."""
    assert groups == 1, "Pallas kernel supports groups == 1 only"  # TODO(synk): groups > 1
    stride = _pair(stride)
    padding = _pair(padding)
    dilation = _pair(dilation)

    N, C, H, W = x_nchw.shape
    O, Cg, KH, KW = weight_oihw.shape
    assert Cg == C

    cap = _vmem_capacity_bytes()
    # ~96 MiB on 128 MiB parts (v5e/v6e), ~48 MiB on 64 MiB parts (v7x).
    vmem_limit = min((cap * 3) // 4, 112 * 1024 * 1024)
    budget = (vmem_limit * 17) // 20        # footprint budget with headroom

    if prefer_direct and stride == (1, 1):
        foot = _direct_footprint_bytes(N, C, H, W, O, KH, KW, padding, dilation)
        if foot <= budget:
            return _direct_conv(x_nchw, weight_oihw, bias, padding, dilation,
                                vmem_limit)

    return _im2col_gemm_conv(x_nchw, weight_oihw, bias, stride, padding,
                             dilation, vmem_limit, budget)


def init_resconv2d_params(key, in_channels, out_channels, kernel_size, bias=True):
    """Deterministic init matching ReSpropConvNd.reset_parameters()."""
    kh, kw = kernel_size
    n = in_channels * kh * kw
    stdv = 1.0 / math.sqrt(n)
    kw_key, kb_key = jax.random.split(key)
    weight = jax.random.uniform(
        kw_key, (out_channels, in_channels, kh, kw),
        minval=-stdv, maxval=stdv, dtype=jnp.float32)
    b = None
    if bias:
        b = jax.random.uniform(
            kb_key, (out_channels,), minval=-stdv, maxval=stdv, dtype=jnp.float32)
    return weight, b


if __name__ == "__main__":
    key = jax.random.PRNGKey(0)
    kx, kp = jax.random.split(key)

    # Shapes consistent with the module:
    # ReSConv2d(in_channels=4, out_channels=8, kernel_size=3, stride=1,
    #           padding=1, bias=True), input NCHW = (2, 4, 16, 16).
    N, Cin, H, W = 2, 4, 16, 16
    Cout, Ksz = 8, 3
    stride, padding, dilation = (1, 1), (1, 1), (1, 1)

    x = jax.random.normal(kx, (N, Cin, H, W), dtype=jnp.float32)
    weight, bias = init_resconv2d_params(kp, Cin, Cout, (Ksz, Ksz), bias=True)

    # f32 reference with the same semantics as F.conv2d.
    ref = jax.lax.conv_general_dilated(
        x, weight, window_strides=stride,
        padding=[(padding[0], padding[0]), (padding[1], padding[1])],
        rhs_dilation=dilation,
        dimension_numbers=("NCHW", "OIHW", "NCHW"),
        precision=jax.lax.Precision.HIGHEST,
    ) + bias.reshape(1, Cout, 1, 1)

    def run(prefer_direct):
        fn = jax.jit(functools.partial(
            resconv2d_forward, stride=stride, padding=padding,
            dilation=dilation, groups=1, prefer_direct=prefer_direct))
        return jax.block_until_ready(fn(x, weight, bias))

    TOL = 5e-2  # bf16-operand / f32-accumulate tolerance vs the f32 reference

    out = None
    try:
        cand = run(True)   # direct (no-im2col) fast path
        if cand.shape == ref.shape and float(jnp.max(jnp.abs(cand - ref))) < TOL:
            out = cand
    except Exception:
        out = None

    if out is None:
        # Fall back to the general im2col GEMM kernel path.
        cand = run(False)
        assert cand.shape == ref.shape
        assert float(jnp.max(jnp.abs(cand - ref))) < TOL
        out = cand

    print("KERNEL_OK")
</pallas_src>

<mosaic_0001>
module attributes {stable_mosaic.version = 11 : i64} {
  func.func @kernel(%arg0: i32, %arg1: memref<1x342x4xbf16, #tpu.memory_space<vmem>>, %arg2: memref<9x4x128xbf16, #tpu.memory_space<vmem>>, %arg3: memref<1x128xf32, #tpu.memory_space<vmem>>, %arg4: memref<1x288x128xf32, #tpu.memory_space<vmem>>) attributes {dimension_semantics = [#tpu.dimension_semantics<parallel>], iteration_bounds = array<i64: 2>, scalar_prefetch = 0 : i64, scratch_operands = 0 : i64, tpu.core_type = #tpu.core_type<tc>, window_params = [{transform_indices = @transform_0, window_bounds = array<i64: 1, 342, 4>}, {pipeline_mode = #tpu.pipeline_mode<synchronous>, transform_indices = @transform_1, window_bounds = array<i64: 9, 4, 128>}, {pipeline_mode = #tpu.pipeline_mode<synchronous>, transform_indices = @transform_2, window_bounds = array<i64: 1, 128>}, {transform_indices = @transform_3, window_bounds = array<i64: 1, 288, 128>}]} {
    %c0 = arith.constant 0 : index
    %c0_0 = arith.constant 0 : index
    %c0_1 = arith.constant 0 : index
    %0 = vector.load %arg1[%c0, %c0_0, %c0_1] : memref<1x342x4xbf16, #tpu.memory_space<vmem>>, vector<1x288x4xbf16>
    %1 = vector.shape_cast %0 : vector<1x288x4xbf16> to vector<288x4xbf16>
    %c0_2 = arith.constant 0 : index
    %c0_3 = arith.constant 0 : index
    %c0_4 = arith.constant 0 : index
    %2 = vector.load %arg2[%c0_2, %c0_3, %c0_4] : memref<9x4x128xbf16, #tpu.memory_space<vmem>>, vector<1x4x128xbf16>
    %3 = vector.shape_cast %2 : vector<1x4x128xbf16> to vector<4x128xbf16>
    %cst = arith.constant dense<0.000000e+00> : vector<288x128xf32>
    %4 = tpu.matmul %1, %3, %cst {dimension_numbers = #tpu.dot_dimension_numbers<[1], [0], [0], [1], [0, 0, 1, 1], [], []>} : vector<288x4xbf16>, vector<4x128xbf16>, vector<288x128xf32> -> vector<288x128xf32>
    %c0_5 = arith.constant 0 : index
    %c1 = arith.constant 1 : index
    %c0_6 = arith.constant 0 : index
    %5 = vector.load %arg1[%c0_5, %c1, %c0_6] : memref<1x342x4xbf16, #tpu.memory_space<vmem>>, vector<1x288x4xbf16>
    %6 = vector.shape_cast %5 : vector<1x288x4xbf16> to vector<288x4xbf16>
    %c1_7 = arith.constant 1 : index
    %c0_8 = arith.constant 0 : index
    %c0_9 = arith.constant 0 : index
    %7 = vector.load %arg2[%c1_7, %c0_8, %c0_9] : memref<9x4x128xbf16, #tpu.memory_space<vmem>>, vector<1x4x128xbf16>
    %8 = vector.shape_cast %7 : vector<1x4x128xbf16> to vector<4x128xbf16>
    %cst_10 = arith.constant dense<0.000000e+00> : vector<288x128xf32>
    %9 = tpu.matmul %6, %8, %cst_10 {dimension_numbers = #tpu.dot_dimension_numbers<[1], [0], [0], [1], [0, 0, 1, 1], [], []>} : vector<288x4xbf16>, vector<4x128xbf16>, vector<288x128xf32> -> vector<288x128xf32>
    %10 = arith.addf %4, %9 : vector<288x128xf32>
    %c0_11 = arith.constant 0 : index
    %c2 = arith.constant 2 : index
    %c0_12 = arith.constant 0 : index
    %11 = vector.load %arg1[%c0_11, %c2, %c0_12] : memref<1x342x4xbf16, #tpu.memory_space<vmem>>, vector<1x288x4xbf16>
    %12 = vector.shape_cast %11 : vector<1x288x4xbf16> to vector<288x4xbf16>
    %c2_13 = arith.constant 2 : index
    %c0_14 = arith.constant 0 : index
    %c0_15 = arith.constant 0 : index
    %13 = vector.load %arg2[%c2_13, %c0_14, %c0_15] : memref<9x4x128xbf16, #tpu.memory_space<vmem>>, vector<1x4x128xbf16>
    %14 = vector.shape_cast %13 : vector<1x4x128xbf16> to vector<4x128xbf16>
    %cst_16 = arith.constant dense<0.000000e+00> : vector<288x128xf32>
    %15 = tpu.matmul %12, %14, %cst_16 {dimension_numbers = #tpu.dot_dimension_numbers<[1], [0], [0], [1], [0, 0, 1, 1], [], []>} : vector<288x4xbf16>, vector<4x128xbf16>, vector<288x128xf32> -> vector<288x128xf32>
    %16 = arith.addf %10, %15 : vector<288x128xf32>
    %c0_17 = arith.constant 0 : index
    %c18 = arith.constant 18 : index
    %c0_18 = arith.constant 0 : index
    %17 = vector.load %arg1[%c0_17, %c18, %c0_18] : memref<1x342x4xbf16, #tpu.memory_space<vmem>>, vector<1x288x4xbf16>
    %18 = vector.shape_cast %17 : vector<1x288x4xbf16> to vector<288x4xbf16>
    %c3 = arith.constant 3 : index
    %c0_19 = arith.constant 0 : index
    %c0_20 = arith.constant 0 : index
    %19 = vector.load %arg2[%c3, %c0_19, %c0_20] : memref<9x4x128xbf16, #tpu.memory_space<vmem>>, vector<1x4x128xbf16>
    %20 = vector.shape_cast %19 : vector<1x4x128xbf16> to vector<4x128xbf16>
    %cst_21 = arith.constant dense<0.000000e+00> : vector<288x128xf32>
    %21 = tpu.matmul %18, %20, %cst_21 {dimension_numbers = #tpu.dot_dimension_numbers<[1], [0], [0], [1], [0, 0, 1, 1], [], []>} : vector<288x4xbf16>, vector<4x128xbf16>, vector<288x128xf32> -> vector<288x128xf32>
    %22 = arith.addf %16, %21 : vector<288x128xf32>
    %c0_22 = arith.constant 0 : index
    %c19 = arith.constant 19 : index
    %c0_23 = arith.constant 0 : index
    %23 = vector.load %arg1[%c0_22, %c19, %c0_23] : memref<1x342x4xbf16, #tpu.memory_space<vmem>>, vector<1x288x4xbf16>
    %24 = vector.shape_cast %23 : vector<1x288x4xbf16> to vector<288x4xbf16>
    %c4 = arith.constant 4 : index
    %c0_24 = arith.constant 0 : index
    %c0_25 = arith.constant 0 : index
    %25 = vector.load %arg2[%c4, %c0_24, %c0_25] : memref<9x4x128xbf16, #tpu.memory_space<vmem>>, vector<1x4x128xbf16>
    %26 = vector.shape_cast %25 : vector<1x4x128xbf16> to vector<4x128xbf16>
    %cst_26 = arith.constant dense<0.000000e+00> : vector<288x128xf32>
    %27 = tpu.matmul %24, %26, %cst_26 {dimension_numbers = #tpu.dot_dimension_numbers<[1], [0], [0], [1], [0, 0, 1, 1], [], []>} : vector<288x4xbf16>, vector<4x128xbf16>, vector<288x128xf32> -> vector<288x128xf32>
    %28 = arith.addf %22, %27 : vector<288x128xf32>
    %c0_27 = arith.constant 0 : index
    %c20 = arith.constant 20 : index
    %c0_28 = arith.constant 0 : index
    %29 = vector.load %arg1[%c0_27, %c20, %c0_28] : memref<1x342x4xbf16, #tpu.memory_space<vmem>>, vector<1x288x4xbf16>
    %30 = vector.shape_cast %29 : vector<1x288x4xbf16> to vector<288x4xbf16>
    %c5 = arith.constant 5 : index
    %c0_29 = arith.constant 0 : index
    %c0_30 = arith.constant 0 : index
    %31 = vector.load %arg2[%c5, %c0_29, %c0_30] : memref<9x4x128xbf16, #tpu.memory_space<vmem>>, vector<1x4x128xbf16>
    %32 = vector.shape_cast %31 : vector<1x4x128xbf16> to vector<4x128xbf16>
    %cst_31 = arith.constant dense<0.000000e+00> : vector<288x128xf32>
    %33 = tpu.matmul %30, %32, %cst_31 {dimension_numbers = #tpu.dot_dimension_numbers<[1], [0], [0], [1], [0, 0, 1, 1], [], []>} : vector<288x4xbf16>, vector<4x128xbf16>, vector<288x128xf32> -> vector<288x128xf32>
    %34 = arith.addf %28, %33 : vector<288x128xf32>
    %c0_32 = arith.constant 0 : index
    %c36 = arith.constant 36 : index
    %c0_33 = arith.constant 0 : index
    %35 = vector.load %arg1[%c0_32, %c36, %c0_33] : memref<1x342x4xbf16, #tpu.memory_space<vmem>>, vector<1x288x4xbf16>
    %36 = vector.shape_cast %35 : vector<1x288x4xbf16> to vector<288x4xbf16>
    %c6 = arith.constant 6 : index
    %c0_34 = arith.constant 0 : index
    %c0_35 = arith.constant 0 : index
    %37 = vector.load %arg2[%c6, %c0_34, %c0_35] : memref<9x4x128xbf16, #tpu.memory_space<vmem>>, vector<1x4x128xbf16>
    %38 = vector.shape_cast %37 : vector<1x4x128xbf16> to vector<4x128xbf16>
    %cst_36 = arith.constant dense<0.000000e+00> : vector<288x128xf32>
    %39 = tpu.matmul %36, %38, %cst_36 {dimension_numbers = #tpu.dot_dimension_numbers<[1], [0], [0], [1], [0, 0, 1, 1], [], []>} : vector<288x4xbf16>, vector<4x128xbf16>, vector<288x128xf32> -> vector<288x128xf32>
    %40 = arith.addf %34, %39 : vector<288x128xf32>
    %c0_37 = arith.constant 0 : index
    %c37 = arith.constant 37 : index
    %c0_38 = arith.constant 0 : index
    %41 = vector.load %arg1[%c0_37, %c37, %c0_38] : memref<1x342x4xbf16, #tpu.memory_space<vmem>>, vector<1x288x4xbf16>
    %42 = vector.shape_cast %41 : vector<1x288x4xbf16> to vector<288x4xbf16>
    %c7 = arith.constant 7 : index
    %c0_39 = arith.constant 0 : index
    %c0_40 = arith.constant 0 : index
    %43 = vector.load %arg2[%c7, %c0_39, %c0_40] : memref<9x4x128xbf16, #tpu.memory_space<vmem>>, vector<1x4x128xbf16>
    %44 = vector.shape_cast %43 : vector<1x4x128xbf16> to vector<4x128xbf16>
    %cst_41 = arith.constant dense<0.000000e+00> : vector<288x128xf32>
    %45 = tpu.matmul %42, %44, %cst_41 {dimension_numbers = #tpu.dot_dimension_numbers<[1], [0], [0], [1], [0, 0, 1, 1], [], []>} : vector<288x4xbf16>, vector<4x128xbf16>, vector<288x128xf32> -> vector<288x128xf32>
    %46 = arith.addf %40, %45 : vector<288x128xf32>
    %c0_42 = arith.constant 0 : index
    %c38 = arith.constant 38 : index
    %c0_43 = arith.constant 0 : index
    %47 = vector.load %arg1[%c0_42, %c38, %c0_43] : memref<1x342x4xbf16, #tpu.memory_space<vmem>>, vector<1x288x4xbf16>
    %48 = vector.shape_cast %47 : vector<1x288x4xbf16> to vector<288x4xbf16>
    %c8 = arith.constant 8 : index
    %c0_44 = arith.constant 0 : index
    %c0_45 = arith.constant 0 : index
    %49 = vector.load %arg2[%c8, %c0_44, %c0_45] : memref<9x4x128xbf16, #tpu.memory_space<vmem>>, vector<1x4x128xbf16>
    %50 = vector.shape_cast %49 : vector<1x4x128xbf16> to vector<4x128xbf16>
    %cst_46 = arith.constant dense<0.000000e+00> : vector<288x128xf32>
    %51 = tpu.matmul %48, %50, %cst_46 {dimension_numbers = #tpu.dot_dimension_numbers<[1], [0], [0], [1], [0, 0, 1, 1], [], []>} : vector<288x4xbf16>, vector<4x128xbf16>, vector<288x128xf32> -> vector<288x128xf32>
    %52 = arith.addf %46, %51 : vector<288x128xf32>
    %c0_47 = arith.constant 0 : index
    %c0_48 = arith.constant 0 : index
    %53 = vector.load %arg3[%c0_47, %c0_48] : memref<1x128xf32, #tpu.memory_space<vmem>>, vector<1x128xf32>
    %54 = vector.broadcast %53 : vector<1x128xf32> to vector<288x128xf32>
    %55 = arith.addf %52, %54 : vector<288x128xf32>
    %c0_49 = arith.constant 0 : index
    %c0_50 = arith.constant 0 : index
    %c0_51 = arith.constant 0 : index
    %56 = vector.load %arg4[%c0_49, %c0_50, %c0_51] : memref<1x288x128xf32, #tpu.memory_space<vmem>>, vector<1x288x128xf32>
    %57 = vector.shape_cast %56 : vector<1x288x128xf32> to vector<288x128xf32>
    %58 = vector.shape_cast %55 : vector<288x128xf32> to vector<1x288x128xf32>
    tpu.vector_store %arg4[%c0_49, %c0_50, %c0_51], %58 {strides = array<i32>} : memref<1x288x128xf32, #tpu.memory_space<vmem>>, vector<1x288x128xf32>,
    return
  }
  func.func @transform_0(%arg0: i32) -> (i32, i32, i32) {
    %c0_i32 = arith.constant 0 : i32
    %c0_i32_0 = arith.constant 0 : i32
    %c0_i32_1 = arith.constant 0 : i32
    return %arg0, %c0_i32, %c0_i32_0 : i32, i32, i32
  }
  func.func @transform_1(%arg0: i32) -> (i32, i32, i32) {
    %c0_i32 = arith.constant 0 : i32
    %c0_i32_0 = arith.constant 0 : i32
    %c0_i32_1 = arith.constant 0 : i32
    %c0_i32_2 = arith.constant 0 : i32
    return %c0_i32, %c0_i32_0, %c0_i32_1 : i32, i32, i32
  }
  func.func @transform_2(%arg0: i32) -> (i32, i32) {
    %c0_i32 = arith.constant 0 : i32
    %c0_i32_0 = arith.constant 0 : i32
    %c0_i32_1 = arith.constant 0 : i32
    return %c0_i32, %c0_i32_0 : i32, i32
  }
  func.func @transform_3(%arg0: i32) -> (i32, i32, i32) {
    %c0_i32 = arith.constant 0 : i32
    %c0_i32_0 = arith.constant 0 : i32
    %c0_i32_1 = arith.constant 0 : i32
    return %arg0, %c0_i32, %c0_i32_0 : i32, i32, i32
  }
}

module attributes {stable_mosaic.version = 11 : i64} {
  func.func @_gemm_bias_kernel(%arg0: i32, %arg1: i32, %arg2: i32, %arg3: memref<512x128xbf16, #tpu.memory_space<vmem>>, %arg4: memref<128x128xbf16, #tpu.memory_space<vmem>>, %arg5: memref<1x128xf32, #tpu.memory_space<vmem>>, %arg6: memref<512x128xf32, #tpu.memory_space<vmem>>, %arg7: memref<512x128xf32, #tpu.memory_space<vmem>>) attributes {dimension_semantics = [#tpu.dimension_semantics<parallel>, #tpu.dimension_semantics<parallel>, #tpu.dimension_semantics<arbitrary>], iteration_bounds = array<i64: 1, 1, 1>, scalar_prefetch = 0 : i64, scratch_operands = 1 : i64, tpu.core_type = #tpu.core_type<tc>, window_params = [{transform_indices = @transform_0, window_bounds = array<i64: 512, 128>}, {transform_indices = @transform_1, window_bounds = array<i64: 128, 128>}, {transform_indices = @transform_2, window_bounds = array<i64: 1, 128>}, {transform_indices = @transform_3, window_bounds = array<i64: 512, 128>}]} {
    %c0 = arith.constant 0 : index
    %c0_0 = arith.constant 0 : index
    %0 = vector.load %arg3[%c0, %c0_0] : memref<512x128xbf16, #tpu.memory_space<vmem>>, vector<512x128xbf16>
    %c0_1 = arith.constant 0 : index
    %c0_2 = arith.constant 0 : index
    %1 = vector.load %arg4[%c0_1, %c0_2] : memref<128x128xbf16, #tpu.memory_space<vmem>>, vector<128x128xbf16>
    %cst = arith.constant dense<0.000000e+00> : vector<512x128xf32>
    %2 = tpu.matmul %0, %1, %cst {dimension_numbers = #tpu.dot_dimension_numbers<[1], [0], [0], [1], [0, 0, 1, 1], [], []>} : vector<512x128xbf16>, vector<128x128xbf16>, vector<512x128xf32> -> vector<512x128xf32>
    %c0_i32 = arith.constant 0 : i32
    %3 = arith.cmpi eq, %arg2, %c0_i32 : i32
    %4 = arith.extui %3 : i1 to i32
    %c0_i32_3 = arith.constant 0 : i32
    %5 = arith.cmpi ne, %4, %c0_i32_3 : i32
    scf.if %5 {
      %c0_8 = arith.constant 0 : index
      %c0_9 = arith.constant 0 : index
      %12 = vector.load %arg7[%c0_8, %c0_9] : memref<512x128xf32, #tpu.memory_space<vmem>>, vector<512x128xf32>
      tpu.vector_store %arg7[%c0_8, %c0_9], %2 {strides = array<i32>} : memref<512x128xf32, #tpu.memory_space<vmem>>, vector<512x128xf32>,
    } else {
    }
    %c0_i32_4 = arith.constant 0 : i32
    %6 = arith.cmpi sgt, %arg2, %c0_i32_4 : i32
    %7 = arith.extui %6 : i1 to i32
    %c0_i32_5 = arith.constant 0 : i32
    %8 = arith.cmpi ne, %7, %c0_i32_5 : i32
    scf.if %8 {
      %c0_8 = arith.constant 0 : index
      %c0_9 = arith.constant 0 : index
      %12 = vector.load %arg7[%c0_8, %c0_9] : memref<512x128xf32, #tpu.memory_space<vmem>>, vector<512x128xf32>
      %13 = arith.addf %12, %2 : vector<512x128xf32>
      %c0_10 = arith.constant 0 : index
      %c0_11 = arith.constant 0 : index
      %14 = vector.load %arg7[%c0_10, %c0_11] : memref<512x128xf32, #tpu.memory_space<vmem>>, vector<512x128xf32>
      tpu.vector_store %arg7[%c0_10, %c0_11], %13 {strides = array<i32>} : memref<512x128xf32, #tpu.memory_space<vmem>>, vector<512x128xf32>,
    } else {
    }
    %c0_i32_6 = arith.constant 0 : i32
    %9 = arith.cmpi eq, %arg2, %c0_i32_6 : i32
    %10 = arith.extui %9 : i1 to i32
    %c0_i32_7 = arith.constant 0 : i32
    %11 = arith.cmpi ne, %10, %c0_i32_7 : i32
    scf.if %11 {
      %c0_8 = arith.constant 0 : index
      %c0_9 = arith.constant 0 : index
      %12 = vector.load %arg7[%c0_8, %c0_9] : memref<512x128xf32, #tpu.memory_space<vmem>>, vector<512x128xf32>
      %c0_10 = arith.constant 0 : index
      %c0_11 = arith.constant 0 : index
      %13 = vector.load %arg5[%c0_10, %c0_11] : memref<1x128xf32, #tpu.memory_space<vmem>>, vector<1x128xf32>
      %14 = vector.broadcast %13 : vector<1x128xf32> to vector<512x128xf32>
      %15 = arith.addf %12, %14 : vector<512x128xf32>
      %c0_12 = arith.constant 0 : index
      %c0_13 = arith.constant 0 : index
      %16 = vector.load %arg6[%c0_12, %c0_13] : memref<512x128xf32, #tpu.memory_space<vmem>>, vector<512x128xf32>
      tpu.vector_store %arg6[%c0_12, %c0_13], %15 {strides = array<i32>} : memref<512x128xf32, #tpu.memory_space<vmem>>, vector<512x128xf32>,
    } else {
    }
    return
  }
  func.func @transform_0(%arg0: i32, %arg1: i32, %arg2: i32) -> (i32, i32) {
    %c0_i32 = arith.constant 0 : i32
    return %arg0, %arg2 : i32, i32
  }
  func.func @transform_1(%arg0: i32, %arg1: i32, %arg2: i32) -> (i32, i32) {
    %c0_i32 = arith.constant 0 : i32
    return %arg2, %arg1 : i32, i32
  }
  func.func @transform_2(%arg0: i32, %arg1: i32, %arg2: i32) -> (i32, i32) {
    %c0_i32 = arith.constant 0 : i32
    %c0_i32_0 = arith.constant 0 : i32
    return %c0_i32, %arg1 : i32, i32
  }
  func.func @transform_3(%arg0: i32, %arg1: i32, %arg2: i32) -> (i32, i32) {
    %c0_i32 = arith.constant 0 : i32
    return %arg0, %arg1 : i32, i32
  }
}

</mosaic_0001>

<bundles_post_ra>
// kernel: resconv2d_forward.1
= control target key start
LH: loop header
LB: loop body
LE: loop exit
PB: predicated region body
PF: predicated region fallthrough
CT: control target
= control target key end

     0   :  { %s4920_s12 = smov 0   ;;  %s5838_s0 = inlined_call_operand.vmem [shape: bf16[2,342,4], index: 0, kind: input, shape index: {}]   ;;  %s5839_s1 = inlined_call_operand.vmem [shape: bf16[9,4,128], index: 1, kind: input, shape index: {}]   ;;  %s5840_s2 = inlined_call_operand.vmem [shape: f32[1,128], index: 2, kind: input, shape index: {}]   ;;  %s5841_s3 = inlined_call_operand.vmem [shape: f32[2,288,128], index: 3, kind: output, shape index: {}]  }
   0x1 LB: > { %s3754_s13 = sadd.s32 4294967295, %s4898_s12   ;;  %p3758_p0 = scmp.ge.s32.totalorder %s4898_s12, 1  ;;  %s4898_s12 = sphi %s4920_s12, %s13_s12  }
   0x2   : > { %p137_p1 = scmp.lt.s32.totalorder %s4898_s12, 3 }
   0x4   : > { %p138_p2 = pnand %p3758_p0, %p137_p1 }
   0x5   : > { %vm509_vm0 = vcmask (!%p138_p2), 1041408   ;;  %v3875_v0 = vld [vmem:[%s5839_s1 + $0x8] sm:$0x3] (!%p138_p2)  ;;  %v3761_v1 = vld [vmem:[%s5839_s1 + $0x2] sm:$0x3] (!%p138_p2)  ;;  %p161_p3 = scmp.lt.s32.totalorder (!%p138_p2), %s3754_s13, 1 }
   0x6   : > { %141 = sbr.rel (%p138_p2) target bundleno = 571 (0x23b), region = 32  ;;  %4803 = vmatprep.subr.msk.bf16.mxu0 (!%p138_p2), %vm509_vm0, %v3875_v0  ;;  %4799 = vmatprep.subr.msk.bf16.mxu1 (!%p138_p2), %vm509_vm0, %v3761_v1  ;;  %v4937_v2 = vsel (!%p138_p2), %vm509_vm0, %v3875_v0, 0  ;;  %v511_v3 = vsel (!%p138_p2), %vm509_vm0, %v3761_v1, 0  ;;  %v3895_v4 = vld [vmem:[%s5839_s1 + $0xa] sm:$0x3] (!%p138_p2)  ;;  %vm454_vm2 = vcmask (!%p138_p2), 31744  }
   0x7   : > { %4320 = vmatpush3.bf16.msra.mxu0 (!%p138_p2), %v4937_v2  ;;  %4168 = vmatpush3.bf16.msra.mxu1 (!%p138_p2), %v511_v3  ;;  %v208_v5 = vld [vmem:[%s5839_s1] sm:$0x3] (!%p138_p2)  ;;  %vm305_vm1 = vsmask.f32 (!%p138_p2), 7424  ;;  %v4958_v6 = vsel (!%p138_p2), %vm509_vm0, %v3895_v4, 0  ;;  %vm2112_vm4 = vcmask (!%p138_p2), 1045504  }
   0x8   : > { %4805 = vmatprep.subr.msk.bf16.mxu0 (!%p138_p2), %vm509_vm0, %v3895_v4  ;;  %4800 = vmatprep.subr.msk.bf16.mxu1 (!%p138_p2), %vm509_vm0, %v208_v5  ;;  %vm1665_vm3 = vsmask.f32 (!%p138_p2), 6400  ;;  %v727_v12 = vsel (!%p138_p2), %vm509_vm0, %v208_v5, 0  ;;  %v5006_v39 = vld [vmem:[%s5839_s1 + $0x4] sm:$0x3] (!%p138_p2)  ;;  %vm912_vm5 = vcmask (!%p138_p2), 1046528  }
   0x9   : > { %v5040_v1 = vld [vmem:[%s5839_s1 + $0xc] sm:$0x3] (!%p138_p2)  ;;  %vm2865_vm6 = vsmask.f32 (!%p138_p2), 5376  ;;  %vm3312_vm7 = vcmask (!%p138_p2), 1044480  }
   0xd   : > { %s5843_s13 = smov (!%p161_p3, %s3754_s13), 1 }
   0xe   : > { %s4809_s22 = smul.u32 172, %s5843_s13 }
   0xf   : > { %s4810_s11 = smul.u32 288, %s5843_s13 }
  0x10   : > { %s4955_s25 = scalar_lea.vmem %s5838_s0, %s4809_s22 }
  0x11   : > { %v172_v7 = vld [vmem:[%s4955_s25] sm:$0xf]  ;;  %v4962_v8 = vld [vmem:[%s4955_s25 + $0x4] sm:$0xf]  ;;  %v4968_v10 = vld [vmem:[%s4955_s25 + $0x8] sm:$0xff]   ;;  %s5755_s18 = scalar_lea.vmem %s5841_s3, %s4810_s11 }
  0x12   : > { %v4965_v9 = vcombine.low %v172_v7, %v4962_v8  ;;  %v1220_v11 = vld [vmem:[%s4955_s25 + $0x8] sm:$0xe]  ;;  %v4973_v13 = vld [vmem:[%s4955_s25 + $0xc] sm:$0xf]  ;;  %v314_v16 = vshll.u32 %v4968_v10, 16  ;;  %v318_v17 = vshrl.u32 %v4968_v10, 16 }
  0x13   : > { %v4980_v18 = vld [vmem:[%s4955_s25 + $0x10] sm:$0xff]   ;;  %v4986_v20 = vcombine.low %v1220_v11, %v4973_v13  ;;  %v4994_v28 = vld [vmem:[%s4955_s25 + $0x18] sm:$0xff]   ;;  %v5000_v34 = vld [vmem:[%s4955_s25 + $0x20] sm:$0xff]  }
  0x14   : > { %v307_v14 = vshrl.u32 %v4965_v9, 16  ;;  %v309_v15 = vshll.u32 %v4965_v9, 16  ;;  %v4983_v19 = vld [vmem:[%s4955_s25 + $0x10] sm:$0xff]   ;;  %v316_v22 = vrot.slane %v314_v16, 1  ;;  %v1675_v23 = vshrl.u32 %v4980_v18, 16  ;;  %v4997_v33 = vld [vmem:[%s4955_s25 + $0x18] sm:$0xff]  }
  0x15   : > { %v1678_v24 = vshll.u32 %v4980_v18, 16  ;;  %v1667_v25 = vshrl.u32 %v4986_v20, 16  ;;  %v1670_v26 = vshll.u32 %v4986_v20, 16  ;;  %v322_v27 = vshll.u32 %v4983_v19, 16  ;;  %v5015_v48 = vld [vmem:[%s4955_s25 + $0x20] sm:$0xff]   ;;  %v5018_v49 = vld [vmem:[%s4955_s25 + $0x28] sm:$0xff]  }
  0x16   : > { %v311_v21 = vrot.slane %v309_v15, 1  ;;  %v320_v30 = vor.u32 %v318_v17, %v316_v22  ;;  %v1677_v31 = vrot.slane %v1675_v23, 1  ;;  %v1684_v38 = vshrl.u32 %v4994_v28, 16  ;;  %v5024_v54 = vld [vmem:[%s4955_s25 + $0x28] sm:$0xff]   ;;  %v5030_v59 = vld [vmem:[%s4955_s25 + $0x30] sm:$0xff]   ;;  %v5054_v23 = vld [vmem:[%s4955_s25 + $0x38] sm:$0xff]  }
  0x17   : > { %v1680_v32 = vrot.slane %v1678_v24, 2  ;;  %v1669_v35 = vrot.slane %v1667_v25, 1  ;;  %v1672_v36 = vrot.slane %v1670_v26, 2  ;;  %v324_v37 = vrot.slane %v322_v27, 1  ;;  %v5035_v0 = vld [vmem:[%s4955_s25 + $0x30] sm:$0xff]  }
  0x18   : > { %v312_v29 = vor.u32 %v311_v21, %v307_v14  ;;  %v1687_v42 = vshll.u32 %v4994_v28, 16  ;;  %v326_v43 = vshrl.u32 %v4983_v19, 16  ;;  %v1686_v46 = vrot.slane %v1684_v38, 1 }
  0x19   : > { %v1681_v41 = vor.u32 %v1680_v32, %v1677_v31  ;;  %v1673_v44 = vor.u32 %v1672_v36, %v1669_v35  ;;  %v325_v45 = vsel %vm305_vm1, %v320_v30, %v324_v37  ;;  %v330_v47 = vshll.u32 %v4997_v33, 16  ;;  %v5063_v35 = vld [vmem:[%s4955_s25 + $0x38] sm:$0xff]  }
  0x1a   : > { %v317_v40 = vsel %vm305_vm1, %v312_v29, %v316_v22  ;;  %v1689_v50 = vrot.slane %v1687_v42, 2  ;;  %v328_v51 = vor.u32 %v326_v43, %v324_v37  ;;  %v1693_v52 = vshrl.u32 %v5000_v34, 16 }
  0x1b   : > { %4169 = vmatprep.mubr.msk.bf16.mxu1 %vm454_vm2, %v317_v40  ;;  %v1696_v53 = vshll.u32 %v5000_v34, 16  ;;  %v1682_v55 = vsel %vm1665_vm3, %v1673_v44, %v1681_v41  ;;  %v332_v56 = vrot.slane %v330_v47, 1  ;;  %v334_v57 = vshrl.u32 %v4997_v33, 16  ;;  %v5074_v44 = vld [vmem:[%s4955_s25 + $0x40] sm:$0xff]  }
  0x1c   : > { %4170 = vmatmul.mubr.msk.bf16.vlgmr.msra.gmra.mrb[0].mxu1 %vm454_vm2, %v325_v45  ;;  %v338_v58 = vshll.u32 %v5015_v48, 16  ;;  %4321 = vmatprep.mubr.msk.bf16.mxu0 %vm454_vm2, %v1682_v55  ;;  %v1690_v60 = vor.u32 %v1689_v50, %v1686_v46  ;;  %v1695_v61 = vrot.slane %v1693_v52, 1  ;;  %v1702_v63 = vshrl.u32 %v5018_v49, 16 }
  0x1d   : > { %4206 = vmatpush3.bf16.msra.mxu1 %v727_v12  ;;  %v1698_v62 = vrot.slane %v1696_v53, 2  ;;  %v333_v3 = vsel %vm305_vm1, %v328_v51, %v332_v56  ;;  %v336_v4 = vor.u32 %v334_v57, %v332_v56  ;;  %v1705_v7 = vshll.u32 %v5018_v49, 16  ;;  %v5079_v51 = vld [vmem:[%s4955_s25 + $0x40] sm:$0xff]  }
  0x1e   : > { %4801 = vmatprep.subr.msk.bf16.mxu1 %vm509_vm0, %v5006_v39  ;;  %v340_v5 = vrot.slane %v338_v58, 1  ;;  %v1691_v11 = vsel %vm1665_vm3, %v1681_v41, %v1690_v60  ;;  %4173 = vmatprep.mubr.msk.bf16.mxu1 %vm454_vm2, %v333_v3  ;;  %v1704_v14 = vrot.slane %v1702_v63, 1  ;;  %v342_v15 = vshrl.u32 %v5015_v48, 16  ;;  %v5090_v63 = vld [vmem:[%s4955_s25 + $0x48] sm:$0xff]  }
  0x1f   : > { %v1699_v12 = vor.u32 %v1698_v62, %v1695_v61  ;;  %4322 = vmatmul.mubr.msk.bf16.vlgmr.msra.gmra.mrb[0].mxu0 %vm454_vm2, %v1691_v11  ;;  %v1707_v17 = vrot.slane %v1705_v7, 2  ;;  %v346_v21 = vshll.u32 %v5024_v54, 16  ;;  %v1711_v22 = vshrl.u32 %v5030_v59, 16  ;;  %v5087_v62 = vld [vmem:[%s4955_s25 + $0x48] sm:$0xff]  }
  0x20   : > { %v341_v16 = vsel %vm305_vm1, %v336_v4, %v340_v5  ;;  %4358 = vmatpush3.bf16.msra.mxu0 %v4958_v6  ;;  %v344_v25 = vor.u32 %v342_v15, %v340_v5  ;;  %v1714_v26 = vshll.u32 %v5030_v59, 16  ;;  %v350_v27 = vshrl.u32 %v5024_v54, 16 }
  0x21   : > { %v1700_v24 = vsel %vm1665_vm3, %v1690_v60, %v1699_v12  ;;  %v1708_v29 = vor.u32 %v1707_v17, %v1704_v14  ;;  %v348_v30 = vrot.slane %v346_v21, 1  ;;  %v1713_v31 = vrot.slane %v1711_v22, 1  ;;  %4806 = vmatprep.subr.msk.bf16.mxu0 %vm509_vm0, %v5040_v1  ;;  %v5099_v14 = vld [vmem:[%s4955_s25 + $0x50] sm:$0xff]  }
  0x22   : > { %4325 = vmatprep.mubr.msk.bf16.mxu0 %vm454_vm2, %v1700_v24  ;;  %v354_v32 = vshll.u32 %v5035_v0, 16  ;;  %v1716_v6 = vrot.slane %v1714_v26, 2  ;;  %v1720_v36 = vshrl.u32 %v5054_v23, 16  ;;  %v1723_v37 = vshll.u32 %v5054_v23, 16 }
  0x23   : > { %v358_v38 = vshrl.u32 %v5035_v0, 16  ;;  %v1709_v40 = vsel %vm1665_vm3, %v1699_v12, %v1708_v29  ;;  %v349_v41 = vsel %vm305_vm1, %v344_v25, %v348_v30  ;;  %v352_v42 = vor.u32 %v350_v27, %v348_v30  ;;  %v5107_v25 = vld [vmem:[%s4955_s25 + $0x50] sm:$0xff]  }
  0x24   : > { %4174 = vmatmul.mubr.msk.bf16.gmra.mrb[4].mxu1 %vm454_vm2, %v341_v16  ;;  %v356_v43 = vrot.slane %v354_v32, 1  ;;  %v1717_v45 = vor.u32 %v1716_v6, %v1713_v31  ;;  %v1722_v46 = vrot.slane %v1720_v36, 1  ;;  %v1725_v47 = vrot.slane %v1723_v37, 2 }
  0x25   : > { %4177 = vmatprep.mubr.msk.bf16.mxu1 %vm454_vm2, %v349_v41  ;;  %v362_v50 = vshll.u32 %v5063_v35, 16  ;;  %v1729_v55 = vshrl.u32 %v5074_v44, 16  ;;  %v1732_v56 = vshll.u32 %v5074_v44, 16  ;;  %v366_v61 = vshrl.u32 %v5063_v35, 16  ;;  %v5117_v41 = vld [vmem:[%s4955_s25 + $0x58] sm:$0xff]  }
  0x26   : > { %v357_v52 = vsel %vm305_vm1, %v352_v42, %v356_v43  ;;  %v360_v53 = vor.u32 %v358_v38, %v356_v43  ;;  %v1718_v57 = vsel %vm1665_vm3, %v1708_v29, %v1717_v45  ;;  %v1726_v58 = vor.u32 %v1725_v47, %v1722_v46  ;;  %v5112_v29 = vld [vmem:[%s4955_s25 + $0x58] sm:$0xff]  }
  0x27   : > { %v364_v60 = vrot.slane %v362_v50, 1  ;;  %4326 = vmatmul.mubr.msk.bf16.gmra.mrb[4].mxu0 %vm454_vm2, %v1709_v40  ;;  %v1731_v3 = vrot.slane %v1729_v55, 1  ;;  %v1734_v4 = vrot.slane %v1732_v56, 2  ;;  %v370_v5 = vshll.u32 %v5079_v51, 16 }
  0x28   : > { %v374_v7 = vshrl.u32 %v5079_v51, 16  ;;  %4329 = vmatprep.mubr.msk.bf16.mxu0 %vm454_vm2, %v1718_v57  ;;  %v1738_v12 = vshrl.u32 %v5087_v62, 16  ;;  %v1741_v16 = vshll.u32 %v5087_v62, 16  ;;  %v378_v17 = vshll.u32 %v5090_v63, 16  ;;  %v2106_v57 = vld [vmem:[%s4955_s25 + $0x8] sm:$0xc] }
  0x29   : > { %v365_v11 = vsel %vm305_vm1, %v360_v53, %v364_v60  ;;  %v1735_v15 = vor.u32 %v1734_v4, %v1731_v3  ;;  %v372_v21 = vrot.slane %v370_v5, 1  ;;  %v1747_v22 = vshrl.u32 %v5099_v14, 16 }
  0x2a   : > { %v1750_v24 = vshll.u32 %v5099_v14, 16  ;;  %v1727_v26 = vsel %vm1665_vm3, %v1717_v45, %v1726_v58  ;;  %v368_v27 = vor.u32 %v366_v61, %v364_v60  ;;  %v1740_v30 = vrot.slane %v1738_v12, 1 }
  0x2b   : > { %v1743_v31 = vrot.slane %v1741_v16, 2  ;;  %v376_v32 = vor.u32 %v374_v7, %v372_v21  ;;  %v380_v6 = vrot.slane %v378_v17, 1  ;;  %v1736_v36 = vsel %vm1665_vm3, %v1726_v58, %v1735_v15  ;;  %v5131_v58 = vld [vmem:[%s4955_s25 + $0x60] sm:$0xff]  }
  0x2c   : > { %4178 = vmatmul.mubr.msk.bf16.gmra.mrb[8].mxu1 %vm454_vm2, %v357_v52  ;;  %v1749_v37 = vrot.slane %v1747_v22, 1  ;;  %v1752_v38 = vrot.slane %v1750_v24, 2  ;;  %v386_v40 = vshll.u32 %v5107_v25, 16  ;;  %v373_v42 = vsel %vm305_vm1, %v368_v27, %v372_v21 }
  0x2d   : > { %4181 = vmatprep.mubr.msk.bf16.mxu1 %vm454_vm2, %v365_v11  ;;  %v382_v43 = vshrl.u32 %v5090_v63, 16  ;;  %v1756_v45 = vshrl.u32 %v5112_v29, 16  ;;  %v1759_v46 = vshll.u32 %v5112_v29, 16  ;;  %v1744_v47 = vor.u32 %v1743_v31, %v1740_v30  ;;  %v5136_v11 = vld [vmem:[%s4955_s25 + $0x68] sm:$0xff]  }
  0x2e   : > { %v381_v50 = vsel %vm305_vm1, %v376_v32, %v380_v6  ;;  %v390_v52 = vshrl.u32 %v5107_v25, 16  ;;  %v394_v53 = vshll.u32 %v5117_v41, 16  ;;  %v1753_v55 = vor.u32 %v1752_v38, %v1749_v37  ;;  %v5153_v32 = vld [vmem:[%s4955_s25 + $0x70] sm:$0xff]  }
  0x2f   : > { %4330 = vmatmul.mubr.msk.bf16.gmra.mrb[8].mxu0 %vm454_vm2, %v1727_v26  ;;  %v388_v56 = vrot.slane %v386_v40, 1  ;;  %v384_v60 = vor.u32 %v382_v43, %v380_v6  ;;  %v1758_v61 = vrot.slane %v1756_v45, 1  ;;  %v1761_v3 = vrot.slane %v1759_v46, 2  ;;  %v5159_v40 = vld [vmem:[%s4955_s25 + $0x78] sm:$0xff]  }
  0x30   : > { %4333 = vmatprep.mubr.msk.bf16.mxu0 %vm454_vm2, %v1736_v36  ;;  %v1745_v4 = vsel %vm1665_vm3, %v1735_v15, %v1744_v47  ;;  %v396_v7 = vrot.slane %v394_v53, 1  ;;  %v1754_v12 = vsel %vm1665_vm3, %v1744_v47, %v1753_v55  ;;  %v3896_v16 = vcombine.low %v2106_v57, %v4973_v13 }
  0x31   : > { %v392_v5 = vor.u32 %v390_v52, %v388_v56  ;;  %v402_v17 = vshll.u32 %v5131_v58, 16  ;;  %v389_v21 = vsel %vm305_vm1, %v384_v60, %v388_v56  ;;  %v398_v22 = vshrl.u32 %v5117_v41, 16  ;;  %v5174_v56 = vld [vmem:[%s4955_s25 + $0x80] sm:$0xff]  }
  0x32   : > { %v5145_v15 = vor.u32 %v1761_v3, %v1758_v61  ;;  %v406_v26 = vshrl.u32 %v5131_v58, 16  ;;  %v410_v27 = vshll.u32 %v5136_v11, 16  ;;  %v2113_v13 = vrot.slane %v3896_v16, 2 }
  0x33   : > { %v397_v24 = vsel %vm305_vm1, %v392_v5, %v396_v7  ;;  %v2114_v30 = vrot.slane %v4980_v18, 2  ;;  %v404_v31 = vrot.slane %v402_v17, 1  ;;  %v400_v6 = vor.u32 %v398_v22, %v396_v7 }
  0x34   : > { %4182 = vmatmul.mubr.msk.bf16.gmra.mrb[12].mxu1 %vm454_vm2, %v373_v42  ;;  %v1763_v36 = vsel %vm1665_vm3, %v1753_v55, %v5145_v15  ;;  %v412_v38 = vrot.slane %v410_v27, 1  ;;  %v418_v18 = vshll.u32 %v5153_v32, 16  ;;  %v2116_v45 = vrot.slane %v4994_v28, 2  ;;  %v5204_v27 = vld [vmem:[%s4955_s25 + $0x90] ss:$0 sps:$4 sm:$0x11]  }
  0x35   : > { %4185 = vmatprep.mubr.msk.bf16.mxu1 %vm454_vm2, %v381_v50  ;;  %v408_v37 = vor.u32 %v406_v26, %v404_v31  ;;  %v2115_v42 = vsel %vm2112_vm4, %v2113_v13, %v2114_v30  ;;  %v405_v43 = vsel %vm305_vm1, %v400_v6, %v404_v31  ;;  %v414_v46 = vshrl.u32 %v5136_v11, 16 }
  0x36   : > { %v422_v50 = vshrl.u32 %v5153_v32, 16  ;;  %v426_v52 = vshll.u32 %v5159_v40, 16  ;;  %v2118_v53 = vrot.slane %v5000_v34, 2  ;;  %v420_v55 = vrot.slane %v418_v18, 1  ;;  %v5187_v34 = vld [vmem:[%s5839_s1 + $0xe] sm:$0x3] }
  0x37   : > { %4334 = vmatmul.mubr.msk.bf16.gmra.mrb[12].mxu0 %vm454_vm2, %v1745_v4  ;;  %v413_v47 = vsel %vm305_vm1, %v408_v37, %v412_v38  ;;  %v2644_v28 = vsel %vm509_vm0, %v5040_v1, 0  ;;  %v416_v57 = vor.u32 %v414_v46, %v412_v38  ;;  %v2117_v60 = vsel %vm2112_vm4, %v2114_v30, %v2116_v45  ;;  %v5181_v4 = vld [vmem:[%s4955_s25 + $0x88] sm:$0xff]  }
  0x38   : > { %4337 = vmatprep.mubr.msk.bf16.mxu0 %vm454_vm2, %v1754_v12  ;;  %v424_v61 = vor.u32 %v422_v50, %v420_v55  ;;  %v428_v3 = vrot.slane %v426_v52, 1  ;;  %v2119_v5 = vsel %vm2112_vm4, %v2116_v45, %v2118_v53  ;;  %v434_v7 = vshll.u32 %v5174_v56, 16 }
  0x39   : > { %v421_v1 = vsel %vm305_vm1, %v416_v57, %v420_v55  ;;  %v2120_v12 = vrot.slane %v5018_v49, 2  ;;  %v430_v16 = vshrl.u32 %v5159_v40, 16  ;;  %v442_v22 = vshll.u32 %v5181_v4, 16  ;;  %v5231_v55 = vld [vmem:[%s4955_s25 + $0x60] sm:$0xff]   ;;  %v5250_v57 = vld [vmem:[%s4955_s25 + $0x68] sm:$0xff]  }
  0x3a   : > { %v429_v17 = vsel %vm305_vm1, %v424_v61, %v428_v3  ;;  %v436_v26 = vrot.slane %v434_v7, 1  ;;  %v450_v37 = vshll.u32 %v5204_v27, 16  ;;  %v2124_v38 = vrot.slane %v5054_v23, 2  ;;  %v5268_v7 = vld [vmem:[%s4955_s25 + $0x78] sm:$0xff]  }
  0x3b   : > { %v432_v49 = vor.u32 %v430_v16, %v428_v3  ;;  %v2121_v13 = vsel %vm2112_vm4, %v2118_v53, %v2120_v12  ;;  %v444_v31 = vrot.slane %v442_v22, 1  ;;  %v2126_v18 = vrot.slane %v5074_v44, 2  ;;  %v5284_v22 = vld [vmem:[%s4955_s25 + $0x88] sm:$0xff]  }
  0x3c   : > { %4186 = vmatmul.mubr.msk.bf16.gmra.mrb[16].mxu1 %vm454_vm2, %v389_v21  ;;  %v438_v21 = vshrl.u32 %v5174_v56, 16  ;;  %v452_v45 = vrot.slane %v450_v37, 1  ;;  %v2128_v23 = vrot.slane %v5087_v62, 2  ;;  %v2130_v44 = vrot.slane %v5099_v14, 2 }
  0x3d   : > { %4189 = vmatprep.mubr.msk.bf16.mxu1 %vm454_vm2, %v397_v24  ;;  %v2122_v24 = vrot.slane %v5030_v59, 2  ;;  %v437_v59 = vsel %vm305_vm1, %v432_v49, %v436_v26  ;;  %v2132_v62 = vrot.slane %v5112_v29, 2  ;;  %v1005_v14 = vsel %vm509_vm0, %v5006_v39, 0 }
  0x3e   : > { %v440_v30 = vor.u32 %v438_v21, %v436_v26  ;;  %v2129_v52 = vsel %vm2112_vm4, %v2126_v18, %v2128_v23  ;;  %v2131_v53 = vsel %vm2112_vm4, %v2128_v23, %v2130_v44  ;;  %v2136_v61 = vrot.slane %v5250_v57, 2  ;;  %v5288_v26 = vld [vmem:[%s4955_s25 + $0x90] sm:$0xff]  }
  0x3f   : > { %4338 = vmatmul.mubr.msk.bf16.gmra.mrb[16].mxu0 %vm454_vm2, %v1763_v36  ;;  %v2123_v6 = vsel %vm2112_vm4, %v2120_v12, %v2122_v24  ;;  %v446_v36 = vshrl.u32 %v5181_v4, 16  ;;  %v2125_v46 = vsel %vm2112_vm4, %v2122_v24, %v2124_v38  ;;  %v2133_v29 = vsel %vm2112_vm4, %v2130_v44, %v2132_v62  ;;  %v5272_v12 = vld [vmem:[%s4955_s25 + $0x80] sm:$0xff]  }
  0x40   : > { %4359 = vmatprep.mubr.msk.bf16.mxu0 %vm454_vm2, %v2115_v42  ;;  %v445_v42 = vsel %vm305_vm1, %v440_v30, %v444_v31  ;;  %v2140_v16 = vrot.slane %v5268_v7, 2  ;;  %v2144_v49 = vrot.slane %v5284_v22, 2  ;;  %v2420_v30 = vld [vmem:[%s4955_s25 + $0x10] sm:$0xc] }
  0x44   : > { %4190 = vmatmul.mubr.msk.bf16.gmra.mrb[20].mxu1 %vm454_vm2, %v405_v43  ;;  %v448_v43 = vor.u32 %v446_v36, %v444_v31  ;;  %v5298_v31 = vld [vmem:[%s4955_s25 + $0x14] sm:$0xf] }
  0x45   : > { %4193 = vmatprep.mubr.msk.bf16.mxu1 %vm454_vm2, %v413_v47  ;;  %v2127_v47 = vsel %vm2112_vm4, %v2124_v38, %v2126_v18  ;;  %v5308_v37 = vcombine.low %v2420_v30, %v5298_v31  ;;  %v5311_v38 = vld [vmem:[%s4955_s25 + $0x18] sm:$0xff]  }
  0x46   : > { %v453_v50 = vsel %vm305_vm1, %v448_v43, %v452_v45  ;;  %v2553_v43 = vrot.slane %v5311_v38, 2 }
  0x47   : > { %4360 = vmatmul.mubr.msk.bf16.vlgmr.msra.gmra.mrb[0].mxu0 %vm454_vm2, %v2117_v60  ;;  %v5256_v60 = vld [vmem:[%s4955_s25 + $0x70] sm:$0xff]   ;;  %v2552_v18 = vrot.slane %v5308_v37, 2 }
  0x48   : > { %4396 = vmatpush3.bf16.msra.mxu0 %v2644_v28  ;;  %4363 = vmatprep.mubr.msk.bf16.mxu0 %vm454_vm2, %v2119_v5  ;;  %v2134_v28 = vrot.slane %v5231_v55, 2  ;;  %v2138_v3 = vrot.slane %v5256_v60, 2 }
  0x49   : > { %4807 = vmatprep.subr.msk.bf16.mxu0 %vm509_vm0, %v5187_v34 }
  0x4a   : > { %v2135_v39 = vsel %vm2112_vm4, %v2132_v62, %v2134_v28  ;;  %v2137_v5 = vsel %vm2112_vm4, %v2134_v28, %v2136_v61  ;;  %v2141_v21 = vsel %vm2112_vm4, %v2138_v3, %v2140_v16  ;;  %v3091_v62 = vsel %vm509_vm0, %v5187_v34, 0  ;;  %v5346_v28 = vld [vmem:[%s4955_s25 + $0x38] sm:$0xff]  }
  0x4c   : > { %4194 = vmatmul.mubr.msk.bf16.gmra.mrb[24].mxu1 %vm454_vm2, %v421_v1  ;;  %v2139_v1 = vsel %vm2112_vm4, %v2136_v61, %v2138_v3  ;;  %v2561_v61 = vrot.slane %v5346_v28, 2  ;;  %v5365_v3 = vld [vmem:[%s4955_s25 + $0x40] sm:$0xff]  }
  0x4d   : > { %4197 = vmatprep.mubr.msk.bf16.mxu1 %vm454_vm2, %v429_v17  ;;  %v2142_v17 = vrot.slane %v5272_v12, 2 }
  0x4f   : > { %4364 = vmatmul.mubr.msk.bf16.gmra.mrb[4].mxu0 %vm454_vm2, %v2121_v13  ;;  %v2143_v24 = vsel %vm2112_vm4, %v2140_v16, %v2142_v17  ;;  %v2146_v13 = vrot.slane %v5288_v26, 2  ;;  %v906_v16 = vld [vmem:[%s4955_s25] sm:$0xe] }
  0x50   : > { %4367 = vmatprep.mubr.msk.bf16.mxu0 %vm454_vm2, %v2123_v6  ;;  %v2145_v6 = vsel %vm2112_vm4, %v2142_v17, %v2144_v49  ;;  %v2563_v17 = vrot.slane %v5365_v3, 2 }
  0x51   : > { %v2147_v36 = vsel %vm2112_vm4, %v2144_v49, %v2146_v13 }
  0x52   : > { %v2564_v49 = vsel %vm2112_vm4, %v2561_v61, %v2563_v17 }
  0x54   : > { %4198 = vmatmul.mubr.msk.bf16.gmra.mrb[28].mxu1 %vm454_vm2, %v437_v59  ;;  %v5304_v59 = vld [vmem:[%s4955_s25 + $0x98] ss:$0 sps:$4 sm:$0x33]  }
  0x55   : > { %4201 = vmatprep.mubr.msk.bf16.mxu1 %vm454_vm2, %v445_v42  ;;  %v2148_v42 = vrot.slane %v5304_v59, 2 }
  0x57   : > { %4368 = vmatmul.mubr.msk.bf16.gmra.mrb[8].mxu0 %vm454_vm2, %v2125_v46  ;;  %v2149_v45 = vsel %vm2112_vm4, %v2146_v13, %v2148_v42  ;;  %v5324_v46 = vld [vmem:[%s4955_s25 + $0x20] sm:$0xff]   ;;  %v5383_v13 = vld [vmem:[%s4955_s25 + $0x50] sm:$0xff]  }
  0x58   : > { %4371 = vmatprep.mubr.msk.bf16.mxu0 %vm454_vm2, %v2127_v47  ;;  %v2554_v47 = vsel %vm2112_vm4, %v2552_v18, %v2553_v43  ;;  %v2555_v23 = vrot.slane %v5324_v46, 2  ;;  %v2567_v42 = vrot.slane %v5383_v13, 2 }
  0x5c   : > { %4202 = vmatmul.mubr.msk.bf16.gmra.mrb[32].mxu1 %vm454_vm2, %v453_v50  ;;  %v5328_v50 = vld [vmem:[%s4955_s25 + $0x28] sm:$0xff]  }
  0x5d   : > { %4207 = vmatprep.mubr.msk.bf16.mxu1 %vm454_vm2, %v4965_v9  ;;  %v5242_v9 = vld [vmem:[%s5839_s1 + $0x6] sm:$0x3]  ;;  %v2557_v44 = vrot.slane %v5328_v50, 2 }
  0x5f   : > { %4372 = vmatmul.mubr.msk.bf16.gmra.mrb[12].mxu0 %vm454_vm2, %v2129_v52  ;;  %v2556_v52 = vsel %vm2112_vm4, %v2553_v43, %v2555_v23 }
  0x60   : > { %4375 = vmatprep.mubr.msk.bf16.mxu0 %vm454_vm2, %v2131_v53  ;;  %v5340_v53 = vld [vmem:[%s4955_s25 + $0x30] sm:$0xff]  }
  0x64   : > { %4208 = vmatmul.mubr.msk.bf16.vlgmr.msra.gmra.mrb[0].mxu1 %vm454_vm2, %v4968_v10 }
  0x65   : > { %4211 = vmatprep.mubr.msk.bf16.mxu1 %vm454_vm2, %v4983_v19  ;;  %4244 = vmatpush3.bf16.msra.mxu1 %v1005_v14  ;;  %v2558_v14 = vsel %vm2112_vm4, %v2555_v23, %v2557_v44  ;;  %v918_v23 = vrot.slane %v4997_v33, 1 }
  0x66   : > { %4802 = vmatprep.subr.msk.bf16.mxu1 %vm509_vm0, %v5242_v9 }
  0x67   : > { %4376 = vmatmul.mubr.msk.bf16.gmra.mrb[16].mxu0 %vm454_vm2, %v2133_v29  ;;  %v5351_v29 = vld [vmem:[%s5839_s1 + $0x10] sm:$0x3] }
  0x68   : > { %4379 = vmatprep.mubr.msk.bf16.mxu0 %vm454_vm2, %v2135_v39  ;;  %v2559_v39 = vrot.slane %v5340_v53, 2 }
  0x6a   : > { %v2560_v34 = vsel %vm2112_vm4, %v2557_v44, %v2559_v39 }
  0x6c   : > { %4212 = vmatmul.mubr.msk.bf16.gmra.mrb[4].mxu1 %vm454_vm2, %v4997_v33 }
  0x6d   : > { %4215 = vmatprep.mubr.msk.bf16.mxu1 %vm454_vm2, %v5015_v48 }
  0x6f   : > { %4380 = vmatmul.mubr.msk.bf16.gmra.mrb[20].mxu0 %vm454_vm2, %v2137_v5  ;;  %v2562_v5 = vsel %vm2112_vm4, %v2559_v39, %v2561_v61  ;;  %v1444_v39 = vsel %vm509_vm0, %v5242_v9, 0  ;;  %v920_v61 = vrot.slane %v5015_v48, 1  ;;  %v4881_v9 = vld [vmem:[%s5839_s1 + $0x8] sm:$0x3] }
  0x70   : > { %4383 = vmatprep.mubr.msk.bf16.mxu0 %vm454_vm2, %v2139_v1  ;;  %v5369_v1 = vld [vmem:[%s4955_s25 + $0x48] sm:$0xff]  }
  0x71   : > { %v921_v48 = vsel %vm912_vm5, %v918_v23, %v920_v61 }
  0x74   : > { %4216 = vmatmul.mubr.msk.bf16.gmra.mrb[8].mxu1 %vm454_vm2, %v5024_v54 }
  0x75   : > { %4219 = vmatprep.mubr.msk.bf16.mxu1 %vm454_vm2, %v5035_v0 }
  0x77   : > { %4384 = vmatmul.mubr.msk.bf16.gmra.mrb[24].mxu0 %vm454_vm2, %v2141_v21  ;;  %v3818_v21 = vcombine.low %v906_v16, %v4962_v8  ;;  %v5388_v8 = vld [vmem:[%s4955_s25 + $0x58] sm:$0xff]   ;;  %v922_v16 = vrot.slane %v5024_v54, 1 }
  0x78   : > { %4387 = vmatprep.mubr.msk.bf16.mxu0 %vm454_vm2, %v2143_v24  ;;  %v2565_v24 = vrot.slane %v5369_v1, 2  ;;  %v2569_v43 = vrot.slane %v5388_v8, 2 }
  0x79   : > { %v913_v30 = vrot.slane %v3818_v21, 1  ;;  %v5430_v21 = vld [vmem:[%s4955_s25 + $0x78] sm:$0xff]   ;;  %v923_v54 = vsel %vm912_vm5, %v920_v61, %v922_v16 }
  0x7a   : > { %v2570_v44 = vsel %vm2112_vm4, %v2567_v42, %v2569_v43 }
  0x7c   : > { %4220 = vmatmul.mubr.msk.bf16.gmra.mrb[12].mxu1 %vm454_vm2, %v5063_v35 }
  0x7d   : > { %4223 = vmatprep.mubr.msk.bf16.mxu1 %vm454_vm2, %v5079_v51 }
  0x7f   : > { %4388 = vmatmul.mubr.msk.bf16.gmra.mrb[28].mxu0 %vm454_vm2, %v2145_v6  ;;  %v914_v6 = vrot.slane %v4968_v10, 1  ;;  %v916_v10 = vrot.slane %v4983_v19, 1 }
  0x80   : > { %4391 = vmatprep.mubr.msk.bf16.mxu0 %vm454_vm2, %v2147_v36  ;;  %v2566_v36 = vsel %vm2112_vm4, %v2563_v17, %v2565_v24 }
  0x81   : > { %v915_v18 = vsel %vm912_vm5, %v913_v30, %v914_v6  ;;  %v924_v30 = vrot.slane %v5035_v0, 1 }
  0x84   : > { %4224 = vmatmul.mubr.msk.bf16.gmra.mrb[16].mxu1 %vm454_vm2, %v5090_v63 }
  0x85   : > { %4227 = vmatprep.mubr.msk.bf16.mxu1 %vm454_vm2, %v5107_v25 }
  0x87   : > { %4392 = vmatmul.mubr.msk.bf16.gmra.mrb[32].mxu0 %vm454_vm2, %v2149_v45  ;;  %v2568_v45 = vsel %vm2112_vm4, %v2565_v24, %v2567_v42  ;;  %v926_v42 = vrot.slane %v5063_v35, 1  ;;  %v928_v35 = vrot.slane %v5079_v51, 1 }
  0x88   : > { %4397 = vmatprep.mubr.msk.bf16.mxu0 %vm454_vm2, %v2554_v47  ;;  %v5401_v47 = vld [vmem:[%s4955_s25 + $0x60] sm:$0xff]  }
  0x89   : > { %v2571_v19 = vrot.slane %v5401_v47, 2 }
  0x8c   : > { %4228 = vmatmul.mubr.msk.bf16.gmra.mrb[20].mxu1 %vm454_vm2, %v5117_v41 }
  0x8d   : > { %4231 = vmatprep.mubr.msk.bf16.mxu1 %vm454_vm2, %v5131_v58 }
  0x8f   : > { %4398 = vmatmul.mubr.msk.bf16.vlgmr.msra.gmra.mrb[0].mxu0 %vm454_vm2, %v2556_v52  ;;  %v5406_v52 = vld [vmem:[%s4955_s25 + $0x68] sm:$0xff]  }
  0x90   : > { %4434 = vmatpush3.bf16.msra.mxu0 %v3091_v62  ;;  %4401 = vmatprep.mubr.msk.bf16.mxu0 %vm454_vm2, %v2558_v14  ;;  %v917_v62 = vsel %vm912_vm5, %v914_v6, %v916_v10  ;;  %v919_v14 = vsel %vm912_vm5, %v916_v10, %v918_v23  ;;  %v2573_v33 = vrot.slane %v5406_v52, 2  ;;  %v925_v10 = vsel %vm912_vm5, %v922_v16, %v924_v30 }
  0x91   : > { %4808 = vmatprep.subr.msk.bf16.mxu0 %vm509_vm0, %v5351_v29  ;;  %v2867_v16 = vshrl.u32 %v5308_v37, 16 }
  0x92   : > { %v2574_v17 = vsel %vm2112_vm4, %v2571_v19, %v2573_v33 }
  0x94   : > { %4232 = vmatmul.mubr.msk.bf16.gmra.mrb[24].mxu1 %vm454_vm2, %v5136_v11 }
  0x95   : > { %4235 = vmatprep.mubr.msk.bf16.mxu1 %vm454_vm2, %v5153_v32 }
  0x97   : > { %4402 = vmatmul.mubr.msk.bf16.gmra.mrb[4].mxu0 %vm454_vm2, %v2560_v34  ;;  %v2572_v34 = vsel %vm2112_vm4, %v2569_v43, %v2571_v19  ;;  %v5448_v43 = vld [vmem:[%s4955_s25 + $0x88] sm:$0xff]   ;;  %v930_v19 = vrot.slane %v5090_v63, 1  ;;  %v2870_v63 = vshll.u32 %v5308_v37, 16 }
  0x98   : > { %4405 = vmatprep.mubr.msk.bf16.mxu0 %vm454_vm2, %v2562_v5  ;;  %v5421_v5 = vld [vmem:[%s4955_s25 + $0x70] sm:$0xff]   ;;  %v2581_v23 = vrot.slane %v5448_v43, 2 }
  0x99   : > { %v2575_v24 = vrot.slane %v5421_v5, 2  ;;  %v931_v51 = vsel %vm912_vm5, %v928_v35, %v930_v19 }
  0x9b   : > { %v2576_v6 = vsel %vm2112_vm4, %v2573_v33, %v2575_v24  ;;  %v929_v33 = vsel %vm912_vm5, %v926_v42, %v928_v35 }
  0x9c   : > { %4236 = vmatmul.mubr.msk.bf16.gmra.mrb[28].mxu1 %vm454_vm2, %v5159_v40 }
  0x9d   : > { %4239 = vmatprep.mubr.msk.bf16.mxu1 %vm454_vm2, %v5174_v56 }
  0x9f   : > { %4406 = vmatmul.mubr.msk.bf16.gmra.mrb[8].mxu0 %vm454_vm2, %v2564_v49  ;;  %v2577_v49 = vrot.slane %v5430_v21, 2 }
  0xa0   : > { %4409 = vmatprep.mubr.msk.bf16.mxu0 %vm454_vm2, %v2566_v36  ;;  %v5443_v36 = vld [vmem:[%s4955_s25 + $0x80] sm:$0xff]  }
  0xa1   : > { %v2579_v0 = vrot.slane %v5443_v36, 2 }
  0xa4   : > { %4240 = vmatmul.mubr.msk.bf16.gmra.mrb[32].mxu1 %vm454_vm2, %v5181_v4 }
  0xa5   : > { %4245 = vmatprep.mubr.msk.bf16.mxu1 %vm454_vm2, %v915_v18  ;;  %v2578_v18 = vsel %vm2112_vm4, %v2575_v24, %v2577_v49 }
  0xa7   : > { %4410 = vmatmul.mubr.msk.bf16.gmra.mrb[12].mxu0 %vm454_vm2, %v2568_v45  ;;  %v927_v45 = vsel %vm912_vm5, %v924_v30, %v926_v42  ;;  %v934_v30 = vrot.slane %v5117_v41, 1  ;;  %v2872_v42 = vrot.slane %v2870_v63, 3  ;;  %v2893_v41 = vshrl.u32 %v5328_v50, 16 }
  0xa8   : > { %4413 = vmatprep.mubr.msk.bf16.mxu0 %vm454_vm2, %v2570_v44  ;;  %v2580_v44 = vsel %vm2112_vm4, %v2577_v49, %v2579_v0  ;;  %v4877_v49 = vld [vmem:[%s4955_s25 + $0xa0] ss:$0 sps:$4 sm:$0x33]  }
  0xac   : > { %4246 = vmatmul.mubr.msk.bf16.vlgmr.msra.gmra.mrb[0].mxu1 %vm454_vm2, %v917_v62  ;;  %v5461_v62 = vld [vmem:[%s4955_s25 + $0x90] sm:$0xff]  }
  0xad   : > { %4249 = vmatprep.mubr.msk.bf16.mxu1 %vm454_vm2, %v919_v14  ;;  %4282 = vmatpush3.bf16.msra.mxu1 %v1444_v39  ;;  %v5465_v14 = vld [vmem:[%s4955_s25 + $0x98] sm:$0xff]   ;;  %v2582_v39 = vsel %vm2112_vm4, %v2579_v0, %v2581_v23  ;;  %v2583_v61 = vrot.slane %v5461_v62, 2  ;;  %v2587_v0 = vrot.slane %v4877_v49, 2 }
  0xae   : > { %4804 = vmatprep.subr.msk.bf16.mxu1 %vm509_vm0, %v4881_v9  ;;  %v2875_v9 = vshrl.u32 %v5311_v38, 16 }
  0xaf   : > { %4414 = vmatmul.mubr.msk.bf16.gmra.mrb[16].mxu0 %vm454_vm2, %v2572_v34  ;;  %v2585_v34 = vrot.slane %v5465_v14, 2  ;;  %v2584_v24 = vsel %vm2112_vm4, %v2581_v23, %v2583_v61  ;;  %v2887_v23 = vshll.u32 %v5324_v46, 16 }
  0xb0   : > { %4417 = vmatprep.mubr.msk.bf16.mxu0 %vm454_vm2, %v2574_v17  ;;  %v2878_v17 = vshll.u32 %v5311_v38, 16  ;;  %v2877_v37 = vrot.slane %v2875_v9, 2  ;;  %v2895_v9 = vrot.slane %v2893_v41, 2  ;;  %v2920_v41 = vshrl.u32 %v5365_v3, 16 }
  0xb4   : > { %4250 = vmatmul.mubr.msk.bf16.gmra.mrb[4].mxu1 %vm454_vm2, %v921_v48  ;;  %v932_v48 = vrot.slane %v5107_v25, 1 }
  0xb5   : > { %4253 = vmatprep.mubr.msk.bf16.mxu1 %vm454_vm2, %v923_v54  ;;  %v2586_v54 = vsel %vm2112_vm4, %v2583_v61, %v2585_v34 }
  0xb6   : > { %v935_v25 = vsel %vm912_vm5, %v932_v48, %v934_v30 }
  0xb7   : > { %4418 = vmatmul.mubr.msk.bf16.gmra.mrb[20].mxu0 %vm454_vm2, %v2576_v6  ;;  %v2869_v6 = vrot.slane %v2867_v16, 2  ;;  %v938_v16 = vrot.slane %v5136_v11, 1  ;;  %v2911_v11 = vshrl.u32 %v5346_v28, 16 }
  0xb8   : > { %4421 = vmatprep.mubr.msk.bf16.mxu0 %vm454_vm2, %v2578_v18  ;;  %v2880_v18 = vrot.slane %v2878_v17, 3 }
  0xb9   : > { %v2873_v35 = vor.u32 %v2872_v42, %v2869_v6  ;;  %v2914_v6 = vshll.u32 %v5346_v28, 16 }
  0xbc   : > { %4254 = vmatmul.mubr.msk.bf16.gmra.mrb[8].mxu1 %vm454_vm2, %v925_v10  ;;  %v933_v10 = vsel %vm912_vm5, %v930_v19, %v932_v48  ;;  %v936_v19 = vrot.slane %v5131_v58, 1  ;;  %v2902_v58 = vshrl.u32 %v5340_v53, 16 }
  0xbd   : > { %4257 = vmatprep.mubr.msk.bf16.mxu1 %vm454_vm2, %v927_v45  ;;  %v2884_v45 = vshrl.u32 %v5324_v46, 16 }
  0xbe   : > { %v937_v48 = vsel %vm912_vm5, %v934_v30, %v936_v19  ;;  %v940_v30 = vrot.slane %v5153_v32, 1  ;;  %v2923_v32 = vshll.u32 %v5365_v3, 16 }
  0xbf   : > { %4422 = vmatmul.mubr.msk.bf16.gmra.mrb[24].mxu0 %vm454_vm2, %v2580_v44  ;;  %v2881_v44 = vor.u32 %v2880_v18, %v2877_v37  ;;  %v2886_v61 = vrot.slane %v2884_v45, 2  ;;  %v2904_v37 = vrot.slane %v2902_v58, 2  ;;  %v2913_v45 = vrot.slane %v2911_v11, 2 }
  0xc0   : > { %4425 = vmatprep.mubr.msk.bf16.mxu0 %vm454_vm2, %v2582_v39  ;;  %v2896_v39 = vshll.u32 %v5328_v50, 16  ;;  %v2938_v58 = vshrl.u32 %v5383_v13, 16  ;;  %v2950_v11 = vshll.u32 %v5388_v8, 16 }
  0xc1   : > { %v2882_v63 = vsel %vm2865_vm6, %v2873_v35, %v2881_v44  ;;  %v941_v35 = vsel %vm912_vm5, %v938_v16, %v940_v30 }
  0xc2   : > { %v2898_v17 = vrot.slane %v2896_v39, 3 }
  0xc4   : > { %4258 = vmatmul.mubr.msk.bf16.gmra.mrb[12].mxu1 %vm454_vm2, %v929_v33  ;;  %v2588_v33 = vsel %vm2112_vm4, %v2585_v34, %v2587_v0  ;;  %v2905_v34 = vshll.u32 %v5340_v53, 16  ;;  %v2899_v49 = vor.u32 %v2898_v17, %v2895_v9  ;;  %v3405_v0 = vsel %vm509_vm0, %v5351_v29, 0 }
  0xc5   : > { %4261 = vmatprep.mubr.msk.bf16.mxu1 %vm454_vm2, %v931_v51  ;;  %v2889_v51 = vrot.slane %v2887_v23, 3  ;;  %v2916_v23 = vrot.slane %v2914_v6, 3  ;;  %v2929_v29 = vshrl.u32 %v5369_v1, 16 }
  0xc6   : > { %v2907_v18 = vrot.slane %v2905_v34, 3  ;;  %v2941_v34 = vshll.u32 %v5383_v13, 16 }
  0xc7   : > { %4426 = vmatmul.mubr.msk.bf16.gmra.mrb[28].mxu0 %vm454_vm2, %v2584_v24  ;;  %v2890_v24 = vor.u32 %v2889_v51, %v2886_v61  ;;  %v2917_v39 = vor.u32 %v2916_v23, %v2913_v45  ;;  %v2922_v61 = vrot.slane %v2920_v41, 2  ;;  %v2925_v51 = vrot.slane %v2923_v32, 3 }
  0xc8   : > { %4429 = vmatprep.mubr.msk.bf16.mxu0 %vm454_vm2, %v2586_v54  ;;  %v939_v54 = vsel %vm912_vm5, %v936_v19, %v938_v16  ;;  %v2932_v19 = vshll.u32 %v5369_v1, 16  ;;  %v2931_v17 = vrot.slane %v2929_v29, 2  ;;  %v2952_v23 = vrot.slane %v2950_v11, 3  ;;  %v4883_v29 = vld [vmem:[%s4955_s25 + $0x18] sm:$0xff]  }
  0xc9   : > { %v2891_v42 = vsel %vm2865_vm6, %v2881_v44, %v2890_v24  ;;  %v2908_v44 = vor.u32 %v2907_v18, %v2904_v37  ;;  %v2943_v37 = vrot.slane %v2941_v34, 3  ;;  %v1352_v18 = vrot.slane %v4986_v20, 1 }
  0xca   : > { %v2956_v32 = vshrl.u32 %v5401_v47, 16  ;;  %v2959_v20 = vshll.u32 %v5401_v47, 16  ;;  %v2977_v34 = vshll.u32 %v5421_v5, 16  ;;  %v2986_v11 = vshll.u32 %v5430_v21, 16 }
  0xcb   : > { %v2909_v16 = vsel %vm2865_vm6, %v2899_v49, %v2908_v44  ;;  %v2918_v9 = vsel %vm2865_vm6, %v2908_v44, %v2917_v39 }
  0xcc   : > { %4262 = vmatmul.mubr.msk.bf16.gmra.mrb[16].mxu1 %vm454_vm2, %v933_v10  ;;  %v942_v10 = vrot.slane %v5159_v40, 1 }
  0xcd   : > { %4265 = vmatprep.mubr.msk.bf16.mxu1 %vm454_vm2, %v935_v25  ;;  %v2900_v25 = vsel %vm2865_vm6, %v2890_v24, %v2899_v49 }
  0xce   : > { %v943_v40 = vsel %vm912_vm5, %v940_v30, %v942_v10  ;;  %v948_v30 = vrot.slane %v5204_v27, 1 }
  0xcf   : > { %4430 = vmatmul.mubr.msk.bf16.gmra.mrb[32].mxu0 %vm454_vm2, %v2588_v33  ;;  %v944_v33 = vrot.slane %v5174_v56, 1 }
  0xd0   : > { %4435 = vmatprep.mubr.msk.bf16.mxu0 %vm454_vm2, %v2882_v63  ;;  %v946_v63 = vrot.slane %v5181_v4, 1  ;;  %v2947_v4 = vshrl.u32 %v5388_v8, 16 }
  0xd1   : > { %v945_v24 = vsel %vm912_vm5, %v942_v10, %v944_v33  ;;  %v4882_v10 = vld [vmem:[%s4955_s25 + $0x10] sm:$0xff]  }
  0xd2   : > { %v947_v56 = vsel %vm912_vm5, %v944_v33, %v946_v63  ;;  %v2949_v45 = vrot.slane %v2947_v4, 2  ;;  %v2983_v4 = vshrl.u32 %v5430_v21, 16 }
  0xd4   : > { %4266 = vmatmul.mubr.msk.bf16.gmra.mrb[20].mxu1 %vm454_vm2, %v937_v48  ;;  %v2934_v48 = vrot.slane %v2932_v19, 3  ;;  %v2953_v44 = vor.u32 %v2952_v23, %v2949_v45  ;;  %v1355_v19 = vrot.slane %v4883_v29, 1  ;;  %v2985_v45 = vrot.slane %v2983_v4, 2 }
  0xd5   : > { %4269 = vmatprep.mubr.msk.bf16.mxu1 %vm454_vm2, %v939_v54  ;;  %v2926_v54 = vor.u32 %v2925_v51, %v2922_v61  ;;  %v2958_v61 = vrot.slane %v2956_v32, 2  ;;  %v2961_v51 = vrot.slane %v2959_v20, 3  ;;  %v2988_v23 = vrot.slane %v2986_v11, 3  ;;  %v4889_v11 = vld [vmem:[%s4955_s25 + $0x48] sm:$0xff]  }
  0xd6   : > { %v2935_v49 = vor.u32 %v2934_v48, %v2931_v17  ;;  %v2995_v32 = vshll.u32 %v5443_v36, 16  ;;  %v3022_v4 = vshll.u32 %v5465_v14, 16 }
  0xd7   : > { %4436 = vmatmul.mubr.msk.bf16.vlgmr.msra.gmra.mrb[0].mxu0 %vm454_vm2, %v2891_v42  ;;  %v2927_v6 = vsel %vm2865_vm6, %v2917_v39, %v2926_v54  ;;  %v2940_v42 = vrot.slane %v2938_v58, 2  ;;  %v2968_v39 = vshll.u32 %v5406_v52, 16  ;;  %v2974_v58 = vshrl.u32 %v5421_v5, 16 }
  0xd8   : > { %4472 = vmatpush3.bf16.msra.mxu0 %v3405_v0  ;;  %4439 = vmatprep.mubr.msk.bf16.mxu0 %vm454_vm2, %v2900_v25  ;;  %v1353_v0 = vrot.slane %v4882_v10, 1  ;;  %v2936_v25 = vsel %vm2865_vm6, %v2926_v54, %v2935_v49  ;;  %v2962_v54 = vor.u32 %v2961_v51, %v2958_v61  ;;  %v4886_v10 = vld [vmem:[%s4955_s25 + $0x30] sm:$0xff]   ;;  %v2989_v20 = vor.u32 %v2988_v23, %v2985_v45  ;;  %v4888_v51 = vld [vmem:[%s4955_s25 + $0x40] sm:$0xff]  }
  0xd9   : > { %v2944_v41 = vor.u32 %v2943_v37, %v2940_v42  ;;  %v2970_v48 = vrot.slane %v2968_v39, 3  ;;  %v2976_v37 = vrot.slane %v2974_v58, 2  ;;  %v4887_v39 = vld [vmem:[%s4955_s25 + $0x38] sm:$0xff]   ;;  %v2997_v61 = vrot.slane %v2995_v32, 3 }
  0xda   : > { %v1354_v27 = vsel %vm912_vm5, %v1352_v18, %v1353_v0  ;;  %v2963_v42 = vsel %vm2865_vm6, %v2953_v44, %v2962_v54  ;;  %v2979_v18 = vrot.slane %v2977_v34, 3  ;;  %v1363_v29 = vrot.slane %v4887_v39, 1 }
  0xdb   : > { %v2945_v33 = vsel %vm2865_vm6, %v2935_v49, %v2944_v41  ;;  %v3013_v58 = vshll.u32 %v5461_v62, 16  ;;  %v3024_v23 = vrot.slane %v3022_v4, 3  ;;  %v3318_v4 = vrot.slane %v5328_v50, 3 }
  0xdc   : > { %4270 = vmatmul.mubr.msk.bf16.gmra.mrb[24].mxu1 %vm454_vm2, %v941_v35  ;;  %v949_v35 = vsel %vm912_vm5, %v946_v63, %v948_v30  ;;  %v3320_v50 = vrot.slane %v5340_v53, 3 }
  0xdd   : > { %4273 = vmatprep.mubr.msk.bf16.mxu1 %vm454_vm2, %v943_v40  ;;  %v2965_v40 = vshrl.u32 %v5406_v52, 16 }
  0xdf   : > { %4440 = vmatmul.mubr.msk.bf16.gmra.mrb[4].mxu0 %vm454_vm2, %v2909_v16  ;;  %v4884_v16 = vld [vmem:[%s4955_s25 + $0x20] sm:$0xff]   ;;  %v2967_v17 = vrot.slane %v2965_v40, 2  ;;  %v3004_v40 = vshll.u32 %v5448_v43, 16 }
  0xe0   : > { %4443 = vmatprep.mubr.msk.bf16.mxu0 %vm454_vm2, %v2918_v9  ;;  %v1357_v63 = vrot.slane %v4884_v16, 1  ;;  %v2954_v9 = vsel %vm2865_vm6, %v2944_v41, %v2953_v44  ;;  %v2980_v41 = vor.u32 %v2979_v18, %v2976_v37  ;;  %v3001_v44 = vshrl.u32 %v5448_v43, 16  ;;  %v4890_v18 = vld [vmem:[%s4955_s25 + $0x50] sm:$0xff]  }
  0xe1   : > { %v2971_v49 = vor.u32 %v2970_v48, %v2967_v17  ;;  %v1365_v16 = vrot.slane %v4888_v51, 1  ;;  %v3006_v17 = vrot.slane %v3004_v40, 3  ;;  %v3015_v37 = vrot.slane %v3013_v58, 3  ;;  %v4891_v40 = vld [vmem:[%s4955_s25 + $0x58] sm:$0xff]  }
  0xe2   : > { %v1371_v39 = vrot.slane %v4891_v40, 1  ;;  %v1774_v40 = vshrl.u32 %v5250_v57, 16 }
  0xe4   : > { %4274 = vmatmul.mubr.msk.bf16.gmra.mrb[28].mxu1 %vm454_vm2, %v945_v24  ;;  %v1356_v24 = vsel %vm912_vm5, %v1353_v0, %v1355_v19  ;;  %v1361_v0 = vrot.slane %v4886_v10, 1  ;;  %v1369_v10 = vrot.slane %v4890_v18, 1  ;;  %v3322_v18 = vrot.slane %v5346_v28, 3 }
  0xe5   : > { %4277 = vmatprep.mubr.msk.bf16.mxu1 %vm454_vm2, %v947_v56  ;;  %v1358_v56 = vsel %vm912_vm5, %v1355_v19, %v1357_v63  ;;  %v2981_v19 = vsel %vm2865_vm6, %v2971_v49, %v2980_v41 }
  0xe6   : > { %v1364_v48 = vsel %vm912_vm5, %v1361_v0, %v1363_v29  ;;  %v3323_v53 = vsel %vm3312_vm7, %v3320_v50, %v3322_v18 }
  0xe7   : > { %4444 = vmatmul.mubr.msk.bf16.gmra.mrb[8].mxu0 %vm454_vm2, %v2927_v6  ;;  %v4885_v6 = vld [vmem:[%s4955_s25 + $0x28] sm:$0xff]  }
  0xe8   : > { %4447 = vmatprep.mubr.msk.bf16.mxu0 %vm454_vm2, %v2936_v25  ;;  %v1359_v30 = vrot.slane %v4885_v6, 1  ;;  %v2972_v25 = vsel %vm2865_vm6, %v2962_v54, %v2971_v49  ;;  %v1366_v54 = vsel %vm912_vm5, %v1363_v29, %v1365_v16  ;;  %v3019_v49 = vshrl.u32 %v5465_v14, 16 }
  0xe9   : > { %v1367_v6 = vrot.slane %v4889_v11, 1  ;;  %v1379_v11 = vrot.slane %v5268_v7, 1 }
  0xea   : > { %v3021_v45 = vrot.slane %v3019_v49, 2 }
  0xec   : > { %4278 = vmatmul.mubr.msk.bf16.gmra.mrb[32].mxu1 %vm454_vm2, %v949_v35  ;;  %v1360_v35 = vsel %vm912_vm5, %v1357_v63, %v1359_v30  ;;  %v2990_v63 = vsel %vm2865_vm6, %v2980_v41, %v2989_v20 }
  0xed   : > { %4283 = vmatprep.mubr.msk.bf16.mxu1 %vm454_vm2, %v1354_v27  ;;  %v2992_v27 = vshrl.u32 %v5443_v36, 16 }
  0xef   : > { %4448 = vmatmul.mubr.msk.bf16.gmra.mrb[12].mxu0 %vm454_vm2, %v2945_v33  ;;  %v2994_v33 = vrot.slane %v2992_v27, 2 }
  0xf0   : > { %4451 = vmatprep.mubr.msk.bf16.mxu0 %vm454_vm2, %v2954_v9  ;;  %v3003_v9 = vrot.slane %v3001_v44, 2  ;;  %v3306_v44 = vld [vmem:[%s4955_s25 + $0x10] sm:$0x8] }
  0xf2   : > { %v3007_v34 = vor.u32 %v3006_v17, %v3003_v9 }
  0xf4   : > { %4284 = vmatmul.mubr.msk.bf16.vlgmr.msra.gmra.mrb[0].mxu1 %vm454_vm2, %v1356_v24  ;;  %v2998_v24 = vor.u32 %v2997_v61, %v2994_v33  ;;  %v1373_v61 = vrot.slane %v5231_v55, 1 }
  0xf5   : > { %4287 = vmatprep.mubr.msk.bf16.mxu1 %vm454_vm2, %v1358_v56  ;;  %4510 = vmatpush3.bf16.msra.mxu1 %v4937_v2  ;;  %v1362_v2 = vsel %vm912_vm5, %v1359_v30, %v1361_v0  ;;  %v3010_v56 = vshrl.u32 %v5461_v62, 16  ;;  %v5601_v0 = vld [vmem:[%s4955_s25 + $0xa0] ss:$0 sps:$4 sm:$0x77]  }
  0xf6   : > { %v2999_v30 = vsel %vm2865_vm6, %v2989_v20, %v2998_v24  ;;  %v3028_v27 = vshrl.u32 %v5601_v0, 16  ;;  %v3031_v32 = vshll.u32 %v5601_v0, 16  ;;  %v3025_v20 = vor.u32 %v3024_v23, %v3021_v45 }
  0xf7   : > { %4452 = vmatmul.mubr.msk.bf16.gmra.mrb[16].mxu0 %vm454_vm2, %v2963_v42  ;;  %v3012_v42 = vrot.slane %v3010_v56, 2  ;;  %v1374_v17 = vsel %vm912_vm5, %v1371_v39, %v1373_v61  ;;  %v1377_v56 = vrot.slane %v5256_v60, 1  ;;  %v1385_v45 = vrot.slane %v5288_v26, 1 }
  0xf8   : > { %4455 = vmatprep.mubr.msk.bf16.mxu0 %vm454_vm2, %v2972_v25  ;;  %v3008_v25 = vsel %vm2865_vm6, %v2998_v24, %v3007_v34  ;;  %v3033_v33 = vrot.slane %v3031_v32, 3  ;;  %v3314_v24 = vrot.slane %v5311_v38, 3  ;;  %v3316_v38 = vrot.slane %v5324_v46, 3 }
  0xf9   : > { %v3016_v41 = vor.u32 %v3015_v37, %v3012_v42  ;;  %v1380_v46 = vsel %vm912_vm5, %v1377_v56, %v1379_v11  ;;  %v1765_v23 = vshrl.u32 %v5231_v55, 16 }
  0xfa   : > { %v3319_v42 = vsel %vm3312_vm7, %v3316_v38, %v3318_v4 }
  0xfb   : > { %v3017_v29 = vsel %vm2865_vm6, %v3007_v34, %v3016_v41  ;;  %v3026_v51 = vsel %vm2865_vm6, %v3016_v41, %v3025_v20  ;;  %v4880_v41 = vld [vmem:[%s4955_s25 + $0x98] ss:$0 sps:$4 sm:$0x11]   ;;  %v1767_v32 = vrot.slane %v1765_v23, 1 }
  0xfc   : > { %4288 = vmatmul.mubr.msk.bf16.gmra.mrb[4].mxu1 %vm454_vm2, %v1360_v35  ;;  %v1368_v35 = vsel %vm912_vm5, %v1365_v16, %v1367_v6  ;;  %v3974_v16 = vcombine.low %v3306_v44, %v5298_v31  ;;  %v3326_v44 = vrot.slane %v5369_v1, 3 }
  0xfd   : > { %4291 = vmatprep.mubr.msk.bf16.mxu1 %vm454_vm2, %v1362_v2  ;;  %v1370_v2 = vsel %vm912_vm5, %v1367_v6, %v1369_v10  ;;  %v3317_v6 = vsel %vm3312_vm7, %v3314_v24, %v3316_v38 }
  0xff   : > { %4456 = vmatmul.mubr.msk.bf16.gmra.mrb[20].mxu0 %vm454_vm2, %v2981_v19  ;;  %v3030_v19 = vrot.slane %v3028_v27, 2 }
 0x100   : > { %4459 = vmatprep.mubr.msk.bf16.mxu0 %vm454_vm2, %v2990_v63  ;;  %v1372_v63 = vsel %vm912_vm5, %v1369_v10, %v1371_v39  ;;  %v1383_v10 = vrot.slane %v5284_v22, 1  ;;  %v1777_v39 = vshll.u32 %v5250_v57, 16 }
 0x101   : > { %v3034_v9 = vor.u32 %v3033_v33, %v3030_v19  ;;  %v1786_v33 = vshll.u32 %v5256_v60, 16 }
 0x102   : > { %v1386_v27 = vsel %vm912_vm5, %v1383_v10, %v1385_v45 }
 0x103   : > { %v3035_v31 = vsel %vm2865_vm6, %v3025_v20, %v3034_v9 }
 0x104   : > { %4292 = vmatmul.mubr.msk.bf16.gmra.mrb[8].mxu1 %vm454_vm2, %v1364_v48  ;;  %v3313_v48 = vrot.slane %v3974_v16, 3  ;;  %v1779_v16 = vrot.slane %v1777_v39, 2 }
 0x105   : > { %4295 = vmatprep.mubr.msk.bf16.mxu1 %vm454_vm2, %v1366_v54  ;;  %v1375_v54 = vrot.slane %v5250_v57, 1 }
 0x106   : > { %v3315_v58 = vsel %vm3312_vm7, %v3313_v48, %v3314_v24  ;;  %v3330_v48 = vrot.slane %v5388_v8, 3  ;;  %v1792_v24 = vshrl.u32 %v5268_v7, 16 }
 0x107   : > { %4460 = vmatmul.mubr.msk.bf16.gmra.mrb[24].mxu0 %vm454_vm2, %v2999_v30  ;;  %v1376_v34 = vsel %vm912_vm5, %v1373_v61, %v1375_v54  ;;  %v1378_v49 = vsel %vm912_vm5, %v1375_v54, %v1377_v56  ;;  %v1381_v30 = vrot.slane %v5272_v12, 1  ;;  %v1795_v54 = vshll.u32 %v5268_v7, 16 }
 0x108   : > { %4463 = vmatprep.mubr.msk.bf16.mxu0 %vm454_vm2, %v3008_v25  ;;  %v3321_v25 = vsel %vm3312_vm7, %v3318_v4, %v3320_v50 }
 0x109   : > { %v1382_v37 = vsel %vm912_vm5, %v1379_v11, %v1381_v30  ;;  %v1384_v28 = vsel %vm912_vm5, %v1381_v30, %v1383_v10  ;;  %v1797_v38 = vrot.slane %v1795_v54, 2  ;;  %v1810_v30 = vshrl.u32 %v5284_v22, 16 }
 0x10b   : > { %v1812_v10 = vrot.slane %v1810_v30, 1 }
 0x10c   : > { %4296 = vmatmul.mubr.msk.bf16.gmra.mrb[12].mxu1 %vm454_vm2, %v1368_v35  ;;  %v1768_v35 = vshll.u32 %v5231_v55, 16  ;;  %v1387_v55 = vrot.slane %v4880_v41, 1  ;;  %v1831_v41 = vshll.u32 %v5304_v59, 16 }
 0x10d   : > { %4299 = vmatprep.mubr.msk.bf16.mxu1 %vm454_vm2, %v1370_v2  ;;  %v3324_v2 = vrot.slane %v5365_v3, 3  ;;  %v1783_v3 = vshrl.u32 %v5256_v60, 16 }
 0x10e   : > { %v1770_v20 = vrot.slane %v1768_v35, 2  ;;  %v1388_v1 = vsel %vm912_vm5, %v1385_v45, %v1387_v55  ;;  %v3336_v45 = vrot.slane %v5421_v5, 3 }
 0x10f   : > { %4464 = vmatmul.mubr.msk.bf16.gmra.mrb[28].mxu0 %vm454_vm2, %v3017_v29  ;;  %v3325_v29 = vsel %vm3312_vm7, %v3322_v18, %v3324_v2  ;;  %v3327_v61 = vsel %vm3312_vm7, %v3324_v2, %v3326_v44  ;;  %v1785_v9 = vrot.slane %v1783_v3, 1  ;;  %v3346_v3 = vrot.slane %v5465_v14, 3 }
 0x110   : > { %4467 = vmatprep.mubr.msk.bf16.mxu0 %vm454_vm2, %v3026_v51  ;;  %v1771_v19 = vor.u32 %v1770_v20, %v1767_v32  ;;  %v1776_v51 = vrot.slane %v1774_v40, 1  ;;  %v3342_v40 = vrot.slane %v5448_v43, 3 }
 0x112   : > { %v1772_v57 = vsel %vm1665_vm3, %v5145_v15, %v1771_v19  ;;  %v1780_v60 = vor.u32 %v1779_v16, %v1776_v51  ;;  %v1804_v15 = vshll.u32 %v5272_v12, 16 }
 0x114   : > { %4300 = vmatmul.mubr.msk.bf16.gmra.mrb[16].mxu1 %vm454_vm2, %v1372_v63  ;;  %v3328_v63 = vrot.slane %v5383_v13, 3  ;;  %v1801_v13 = vshrl.u32 %v5272_v12, 16  ;;  %v1781_v8 = vsel %vm1665_vm3, %v1771_v19, %v1780_v60  ;;  %v1806_v11 = vrot.slane %v1804_v15, 2 }
 0x115   : > { %4303 = vmatprep.mubr.msk.bf16.mxu1 %vm454_vm2, %v1374_v17  ;;  %v1788_v17 = vrot.slane %v1786_v33, 2 }
 0x116   : > { %v1803_v4 = vrot.slane %v1801_v13, 1 }
 0x117   : > { %4468 = vmatmul.mubr.msk.bf16.gmra.mrb[32].mxu0 %vm454_vm2, %v3035_v31  ;;  %v3329_v31 = vsel %vm3312_vm7, %v3326_v44, %v3328_v63  ;;  %v1789_v56 = vor.u32 %v1788_v17, %v1785_v9  ;;  %v3340_v44 = vrot.slane %v5443_v36, 3  ;;  %v3344_v36 = vrot.slane %v5461_v62, 3 }
 0x118   : > { %4473 = vmatprep.mubr.msk.bf16.mxu0 %vm454_vm2, %v3315_v58  ;;  %v3331_v58 = vsel %vm3312_vm7, %v3328_v63, %v3330_v48  ;;  %v1807_v50 = vor.u32 %v1806_v11, %v1803_v4 }
 0x119   : > { %v1790_v7 = vsel %vm1665_vm3, %v1780_v60, %v1789_v56  ;;  %v3345_v43 = vsel %vm3312_vm7, %v3342_v40, %v3344_v36  ;;  %v3347_v33 = vsel %vm3312_vm7, %v3344_v36, %v3346_v3 }
 0x11c   : > { %4304 = vmatmul.mubr.msk.bf16.gmra.mrb[20].mxu1 %vm454_vm2, %v1376_v34  ;;  %v1794_v34 = vrot.slane %v1792_v24, 1 }
 0x11d   : > { %4307 = vmatprep.mubr.msk.bf16.mxu1 %vm454_vm2, %v1378_v49  ;;  %v3332_v49 = vrot.slane %v5401_v47, 3  ;;  %v1819_v47 = vshrl.u32 %v5288_v26, 16 }
 0x11e   : > { %v1798_v12 = vor.u32 %v1797_v38, %v1794_v34 }
 0x11f   : > { %4474 = vmatmul.mubr.msk.bf16.vlgmr.msra.gmra.mrb[0].mxu0 %vm454_vm2, %v3317_v6  ;;  %v3334_v6 = vrot.slane %v5406_v52, 3  ;;  %v1821_v23 = vrot.slane %v1819_v47, 1 }
 0x120   : > { %4477 = vmatprep.mubr.msk.bf16.mxu0 %vm454_vm2, %v3319_v42  ;;  %v1813_v42 = vshll.u32 %v5284_v22, 16  ;;  %v1799_v52 = vsel %vm1665_vm3, %v1789_v56, %v1798_v12  ;;  %v1808_v22 = vsel %vm1665_vm3, %v1798_v12, %v1807_v50 }
 0x121   : > { %v3335_v18 = vsel %vm3312_vm7, %v3332_v49, %v3334_v6  ;;  %v3337_v2 = vsel %vm3312_vm7, %v3334_v6, %v3336_v45 }
 0x124   : > { %4308 = vmatmul.mubr.msk.bf16.gmra.mrb[24].mxu1 %vm454_vm2, %v1380_v46  ;;  %v3333_v46 = vsel %vm3312_vm7, %v3330_v48, %v3332_v49  ;;  %v5750_v49 = vld [vmem:[%s5840_s2] ss:$0 sm:$0xff] }
 0x125   : > { %4311 = vmatprep.mubr.msk.bf16.mxu1 %vm454_vm2, %v1382_v37  ;;  %v1822_v37 = vshll.u32 %v5288_v26, 16 }
 0x127   : > { %4478 = vmatmul.mubr.msk.bf16.gmra.mrb[4].mxu0 %vm454_vm2, %v3321_v25  ;;  %v1815_v25 = vrot.slane %v1813_v42, 2  ;;  %v1824_v35 = vrot.slane %v1822_v37, 2 }
 0x128   : > { %4481 = vmatprep.mubr.msk.bf16.mxu0 %vm454_vm2, %v3323_v53  ;;  %v3338_v53 = vrot.slane %v5430_v21, 3  ;;  %v1833_v21 = vrot.slane %v1831_v41, 2 }
 0x129   : > { %v1816_v26 = vor.u32 %v1815_v25, %v1812_v10 }
 0x12a   : > { %v3339_v5 = vsel %vm3312_vm7, %v3336_v45, %v3338_v53  ;;  %v3341_v39 = vsel %vm3312_vm7, %v3338_v53, %v3340_v44 }
 0x12b   : > { %v1817_v32 = vsel %vm1665_vm3, %v1807_v50, %v1816_v26 }
 0x12c   : > { %4312 = vmatmul.mubr.msk.bf16.gmra.mrb[28].mxu1 %vm454_vm2, %v1384_v28  ;;  %v1828_v28 = vshrl.u32 %v5304_v59, 16 }
 0x12d   : > { %4315 = vmatprep.mubr.msk.bf16.mxu1 %vm454_vm2, %v1386_v27  ;;  %v1825_v27 = vor.u32 %v1824_v35, %v1821_v23 }
 0x12e   : > { %v1830_v20 = vrot.slane %v1828_v28, 1 }
 0x12f   : > { %4482 = vmatmul.mubr.msk.bf16.gmra.mrb[8].mxu0 %vm454_vm2, %v3325_v29  ;;  %v1826_v55 = vsel %vm1665_vm3, %v1816_v26, %v1825_v27  ;;  %v3343_v29 = vsel %vm3312_vm7, %v3340_v44, %v3342_v40 }
 0x130   : > { %4485 = vmatprep.mubr.msk.bf16.mxu0 %vm454_vm2, %v3327_v61  ;;  %v1834_v59 = vor.u32 %v1833_v21, %v1830_v20  ;;  %v3348_v61 = vrot.slane %v5601_v0, 3 }
 0x132   : > { %v1835_v19 = vsel %vm1665_vm3, %v1825_v27, %v1834_v59 }
 0x134   : > { %4316 = vmatmul.mubr.msk.bf16.gmra.mrb[32].mxu1 %vm454_vm2, %v1388_v1  ;;  %v3349_v1 = vsel %vm3312_vm7, %v3346_v3, %v3348_v61 }
 0x135   : > { %4341 = vmatprep.mubr.msk.bf16.mxu1 %vm454_vm2, %v1772_v57 }
 0x137   : > { %4486 = vmatmul.mubr.msk.bf16.gmra.mrb[12].mxu0 %vm454_vm2, %v3329_v31 }
 0x138   : > { %4489 = vmatprep.mubr.msk.bf16.mxu0 %vm454_vm2, %v3331_v58 }
 0x13c   : > { %4342 = vmatmul.mubr.msk.bf16.vlgmr.msra.gmra.mrb[20].mxu1 %vm454_vm2, %v1781_v8 }
 0x13d   : > { %4345 = vmatprep.mubr.msk.bf16.mxu1 %vm454_vm2, %v1790_v7 }
 0x13f   : > { %4490 = vmatmul.mubr.msk.bf16.gmra.mrb[16].mxu0 %vm454_vm2, %v3333_v46 }
 0x140   : > { %4493 = vmatprep.mubr.msk.bf16.mxu0 %vm454_vm2, %v3335_v18 }
 0x144   : > { %4346 = vmatmul.mubr.msk.bf16.gmra.mrb[24].mxu1 %vm454_vm2, %v1799_v52 }
 0x145   : > { %4349 = vmatprep.mubr.msk.bf16.mxu1 %vm454_vm2, %v1808_v22 }
 0x147   : > { %4494 = vmatmul.mubr.msk.bf16.gmra.mrb[20].mxu0 %vm454_vm2, %v3337_v2 }
 0x148   : > { %4497 = vmatprep.mubr.msk.bf16.mxu0 %vm454_vm2, %v3339_v5 }
 0x14c   : > { %4350 = vmatmul.mubr.msk.bf16.gmra.mrb[28].mxu1 %vm454_vm2, %v1817_v32 }
 0x14d   : > { %4353 = vmatprep.mubr.msk.bf16.mxu1 %vm454_vm2, %v1826_v55 }
 0x14f   : > { %4498 = vmatmul.mubr.msk.bf16.gmra.mrb[24].mxu0 %vm454_vm2, %v3341_v39 }
 0x150   : > { %4501 = vmatprep.mubr.msk.bf16.mxu0 %vm454_vm2, %v3343_v29 }
 0x154   : > { %4354 = vmatmul.mubr.msk.bf16.gmra.mrb[32].mxu1 %vm454_vm2, %v1835_v19 }
 0x157   : > { %4502 = vmatmul.mubr.msk.bf16.gmra.mrb[28].mxu0 %vm454_vm2, %v3345_v43 }
 0x158   : > { %4505 = vmatprep.mubr.msk.bf16.mxu0 %vm454_vm2, %v3347_v33 }
 0x15f   : > { %4506 = vmatmul.mubr.msk.bf16.gmra.mrb[32].mxu0 %vm454_vm2, %v3349_v1 }
 0x1c7   : > { %v4285_v51 = vpop.f32.mrb[0].mxu1 }
 0x1c8   : > { %v1480_v62 = vpop.f32.mrb[1].mxu1 }
 0x1c9   : > { %v4286_v16 = vpop.f32.mrb[2].mxu1 }
 0x1ca   : > { %v1483_v14 = vpop.f32.mrb[3].mxu1 }
 0x1cf   : > { %v4289_v63 = vpop.f32.mrb[4].mxu1 }
 0x1d0   : > { %v1496_v57 = vpop.f32.mrb[5].mxu1 }
 0x1d1   : > { %v4290_v9 = vpop.f32.mrb[6].mxu1 }
 0x1d2   : > { %v1499_v17 = vpop.f32.mrb[7].mxu1 }
 0x1d7   : > { %v4293_v48 = vpop.f32.mrb[8].mxu1 }
 0x1d8   : > { %v1512_v60 = vpop.f32.mrb[9].mxu1 }
 0x1d9   : > { %v4294_v24 = vpop.f32.mrb[10].mxu1 }
 0x1da   : > { %v1515_v54 = vpop.f32.mrb[11].mxu1 }
 0x1df   : > { %v4297_v31 = vpop.f32.mrb[12].mxu1 }
 0x1e0   : > { %v1528_v56 = vpop.f32.mrb[13].mxu1 }
 0x1e1   : > { %v5734_v0 = vpop.f32.mrb[14].mxu1 }
 0x1e2   : > { %v5736_v13 = vpop.f32.mrb[15].mxu1 }
 0x1e7   : > { %v5738_v15 = vpop.f32.mrb[16].mxu1 }
 0x1e8   : > { %v5740_v58 = vpop.f32.mrb[17].mxu1 }
 0x1e9   : > { %v5742_v8 = vpop.f32.mrb[18].mxu1 }
 0x1ea   : > { %v5744_v34 = vpop.f32.mrb[19].mxu1 }
 0x1f2   : > { %v4475_v38 = vpop.f32.mrb[0].mxu0 }
 0x1f3   : > { %v4511_v7 = vadd.f32 %v4475_v38, %v4285_v51  ;;  %v3441_v4 = vpop.f32.mrb[1].mxu0 }
 0x1f4   : > { %v4512_v11 = vadd.f32 %v3441_v4, %v1480_v62  ;;  %v4476_v6 = vpop.f32.mrb[2].mxu0 }
 0x1f5   : > { %v3629_v12 = vadd.f32 %v4511_v7, %v5750_v49  ;;  %v4513_v30 = vadd.f32 %v4476_v6, %v4286_v16  ;;  %v3444_v42 = vpop.f32.mrb[3].mxu0 }
 0x1f6   : > { %v3627_v46 = vadd.f32 %v4512_v11, %v5750_v49  ;;  %v4514_v50 = vadd.f32 %v3444_v42, %v1483_v14 }
 0x1f7   : > { %3665 = vst [vmem:[%s5755_s18 + $0x10] sm:$0xff] %v3629_v12  ;;  %v3630_v47 = vadd.f32 %v4513_v30, %v5750_v49 }
 0x1f8   : > { %3663 = vst [vmem:[%s5755_s18] sm:$0xff] %v3627_v46  ;;  %v3628_v37 = vadd.f32 %v4514_v50, %v5750_v49 }
 0x1f9   : > { %3666 = vst [vmem:[%s5755_s18 + $0x18] sm:$0xff] %v3630_v47 }
 0x1fa   : > { %3664 = vst [vmem:[%s5755_s18 + $0x8] sm:$0xff] %v3628_v37  ;;  %v4479_v18 = vpop.f32.mrb[4].mxu0 }
 0x1fb   : > { %v4515_v52 = vadd.f32 %v4479_v18, %v4289_v63  ;;  %v3457_v10 = vpop.f32.mrb[5].mxu0 }
 0x1fc   : > { %v4516_v25 = vadd.f32 %v3457_v10, %v1496_v57  ;;  %v4480_v45 = vpop.f32.mrb[6].mxu0 }
 0x1fd   : > { %v3633_v22 = vadd.f32 %v4515_v52, %v5750_v49  ;;  %v4517_v23 = vadd.f32 %v4480_v45, %v4290_v9  ;;  %v3460_v35 = vpop.f32.mrb[7].mxu0 }
 0x1fe   : > { %v3631_v53 = vadd.f32 %v4516_v25, %v5750_v49  ;;  %v4518_v26 = vadd.f32 %v3460_v35, %v1499_v17 }
 0x1ff   : > { %3669 = vst [vmem:[%s5755_s18 + $0x30] sm:$0xff] %v3633_v22  ;;  %v3634_v28 = vadd.f32 %v4517_v23, %v5750_v49 }
 0x200   : > { %3667 = vst [vmem:[%s5755_s18 + $0x20] sm:$0xff] %v3631_v53  ;;  %v3632_v41 = vadd.f32 %v4518_v26, %v5750_v49 }
 0x201   : > { %3670 = vst [vmem:[%s5755_s18 + $0x38] sm:$0xff] %v3634_v28 }
 0x202   : > { %3668 = vst [vmem:[%s5755_s18 + $0x28] sm:$0xff] %v3632_v41  ;;  %v4483_v2 = vpop.f32.mrb[8].mxu0 }
 0x203   : > { %v4519_v27 = vadd.f32 %v4483_v2, %v4293_v48  ;;  %v3473_v5 = vpop.f32.mrb[9].mxu0 }
 0x204   : > { %v4520_v32 = vadd.f32 %v3473_v5, %v1512_v60  ;;  %v4484_v20 = vpop.f32.mrb[10].mxu0 }
 0x205   : > { %v3637_v21 = vadd.f32 %v4519_v27, %v5750_v49  ;;  %v4521_v44 = vadd.f32 %v4484_v20, %v4294_v24  ;;  %v3476_v55 = vpop.f32.mrb[11].mxu0 }
 0x206   : > { %v3635_v40 = vadd.f32 %v4520_v32, %v5750_v49  ;;  %v4522_v59 = vadd.f32 %v3476_v55, %v1515_v54 }
 0x207   : > { %3673 = vst [vmem:[%s5755_s18 + $0x50] sm:$0xff] %v3637_v21  ;;  %v3638_v39 = vadd.f32 %v4521_v44, %v5750_v49 }
 0x208   : > { %3671 = vst [vmem:[%s5755_s18 + $0x40] sm:$0xff] %v3635_v40  ;;  %v3636_v29 = vadd.f32 %v4522_v59, %v5750_v49 }
 0x209   : > { %3674 = vst [vmem:[%s5755_s18 + $0x58] sm:$0xff] %v3638_v39 }
 0x20a   : > { %3672 = vst [vmem:[%s5755_s18 + $0x48] sm:$0xff] %v3636_v29  ;;  %v4487_v19 = vpop.f32.mrb[12].mxu0 }
 0x20b   : > { %v4523_v36 = vadd.f32 %v4487_v19, %v4297_v31  ;;  %v3489_v3 = vpop.f32.mrb[13].mxu0 }
 0x20c   : > { %v4524_v43 = vadd.f32 %v3489_v3, %v1528_v56  ;;  %v4488_v33 = vpop.f32.mrb[14].mxu0 }
 0x20d   : > { %v3641_v61 = vadd.f32 %v4523_v36, %v5750_v49  ;;  %v4525_v1 = vadd.f32 %v4488_v33, %v5734_v0  ;;  %v3492_v51 = vpop.f32.mrb[15].mxu0 }
 0x20e   : > { %v3639_v16 = vadd.f32 %v4524_v43, %v5750_v49  ;;  %v4526_v14 = vadd.f32 %v3492_v51, %v5736_v13 }
 0x20f   : > { %v4343_v62 = vpop.f32.mrb[20].mxu1  ;;  %3677 = vst [vmem:[%s5755_s18 + $0x70] sm:$0xff] %v3641_v61  ;;  %v3642_v57 = vadd.f32 %v4525_v1, %v5750_v49 }
 0x210   : > { %v2007_v63 = vpop.f32.mrb[21].mxu1  ;;  %3675 = vst [vmem:[%s5755_s18 + $0x60] sm:$0xff] %v3639_v16  ;;  %v3640_v17 = vadd.f32 %v4526_v14, %v5750_v49 }
 0x211   : > { %v4344_v9 = vpop.f32.mrb[22].mxu1  ;;  %3678 = vst [vmem:[%s5755_s18 + $0x78] sm:$0xff] %v3642_v57 }
 0x212   : > { %v2010_v48 = vpop.f32.mrb[23].mxu1  ;;  %3676 = vst [vmem:[%s5755_s18 + $0x68] sm:$0xff] %v3640_v17  ;;  %v4491_v60 = vpop.f32.mrb[16].mxu0 }
 0x213   : > { %v4527_v24 = vadd.f32 %v4491_v60, %v5738_v15  ;;  %v3505_v54 = vpop.f32.mrb[17].mxu0 }
 0x214   : > { %v4528_v31 = vadd.f32 %v3505_v54, %v5740_v58  ;;  %v4492_v56 = vpop.f32.mrb[18].mxu0 }
 0x215   : > { %v3645_v0 = vadd.f32 %v4527_v24, %v5750_v49  ;;  %v4529_v13 = vadd.f32 %v4492_v56, %v5742_v8  ;;  %v3508_v38 = vpop.f32.mrb[19].mxu0 }
 0x216   : > { %v3643_v4 = vadd.f32 %v4528_v31, %v5750_v49  ;;  %v4530_v11 = vadd.f32 %v3508_v38, %v5744_v34 }
 0x217   : > { %v4347_v7 = vpop.f32.mrb[24].mxu1  ;;  %3681 = vst [vmem:[%s5755_s18 + $0x90] sm:$0xff] %v3645_v0  ;;  %v3646_v15 = vadd.f32 %v4529_v13, %v5750_v49 }
 0x218   : > { %v2023_v6 = vpop.f32.mrb[25].mxu1  ;;  %3679 = vst [vmem:[%s5755_s18 + $0x80] sm:$0xff] %v3643_v4  ;;  %v3644_v58 = vadd.f32 %v4530_v11, %v5750_v49 }
 0x219   : > { %v4348_v12 = vpop.f32.mrb[26].mxu1  ;;  %3682 = vst [vmem:[%s5755_s18 + $0x98] sm:$0xff] %v3646_v15 }
 0x21a   : > { %v2026_v30 = vpop.f32.mrb[27].mxu1  ;;  %3680 = vst [vmem:[%s5755_s18 + $0x88] sm:$0xff] %v3644_v58  ;;  %v4495_v8 = vpop.f32.mrb[20].mxu0 }
 0x21b   : > { %v4531_v42 = vadd.f32 %v4495_v8, %v4343_v62  ;;  %v3521_v46 = vpop.f32.mrb[21].mxu0 }
 0x21c   : > { %v4532_v50 = vadd.f32 %v3521_v46, %v2007_v63  ;;  %v4496_v34 = vpop.f32.mrb[22].mxu0 }
 0x21d   : > { %v3649_v47 = vadd.f32 %v4531_v42, %v5750_v49  ;;  %v4533_v37 = vadd.f32 %v4496_v34, %v4344_v9  ;;  %v3524_v18 = vpop.f32.mrb[23].mxu0 }
 0x21e   : > { %v3647_v10 = vadd.f32 %v4532_v50, %v5750_v49  ;;  %v4534_v25 = vadd.f32 %v3524_v18, %v2010_v48 }
 0x21f   : > { %v4351_v52 = vpop.f32.mrb[28].mxu1  ;;  %3685 = vst [vmem:[%s5755_s18 + $0xb0] sm:$0xff] %v3649_v47  ;;  %v3650_v22 = vadd.f32 %v4533_v37, %v5750_v49 }
 0x220   : > { %v2039_v45 = vpop.f32.mrb[29].mxu1  ;;  %3683 = vst [vmem:[%s5755_s18 + $0xa0] sm:$0xff] %v3647_v10  ;;  %v3648_v35 = vadd.f32 %v4534_v25, %v5750_v49 }
 0x221   : > { %v4352_v23 = vpop.f32.mrb[30].mxu1  ;;  %3686 = vst [vmem:[%s5755_s18 + $0xb8] sm:$0xff] %v3650_v22 }
 0x222   : > { %v2042_v53 = vpop.f32.mrb[31].mxu1  ;;  %3684 = vst [vmem:[%s5755_s18 + $0xa8] sm:$0xff] %v3648_v35  ;;  %v4499_v26 = vpop.f32.mrb[24].mxu0 }
 0x223   : > { %v4535_v28 = vadd.f32 %v4499_v26, %v4347_v7  ;;  %v3537_v41 = vpop.f32.mrb[25].mxu0 }
 0x224   : > { %v4536_v2 = vadd.f32 %v3537_v41, %v2023_v6  ;;  %v4500_v27 = vpop.f32.mrb[26].mxu0 }
 0x225   : > { %v3653_v5 = vadd.f32 %v4535_v28, %v5750_v49  ;;  %v4537_v32 = vadd.f32 %v4500_v27, %v4348_v12  ;;  %v3540_v20 = vpop.f32.mrb[27].mxu0 }
 0x226   : > { %v3651_v44 = vadd.f32 %v4536_v2, %v5750_v49  ;;  %v4538_v55 = vadd.f32 %v3540_v20, %v2026_v30 }
 0x227   : > { %v4355_v21 = vpop.f32.mrb[32].mxu1  ;;  %3689 = vst [vmem:[%s5755_s18 + $0xd0] sm:$0xff] %v3653_v5  ;;  %v3654_v59 = vadd.f32 %v4537_v32, %v5750_v49 }
 0x228   : > { %v2055_v40 = vpop.f32.mrb[33].mxu1  ;;  %3687 = vst [vmem:[%s5755_s18 + $0xc0] sm:$0xff] %v3651_v44  ;;  %v3652_v29 = vadd.f32 %v4538_v55, %v5750_v49 }
 0x229   : > { %v4356_v39 = vpop.f32.mrb[34].mxu1  ;;  %3690 = vst [vmem:[%s5755_s18 + $0xd8] sm:$0xff] %v3654_v59 }
 0x22a   : > { %v2058_v19 = vpop.f32.mrb[35].mxu1  ;;  %3688 = vst [vmem:[%s5755_s18 + $0xc8] sm:$0xff] %v3652_v29  ;;  %v4503_v36 = vpop.f32.mrb[28].mxu0 }
 0x22b   : > { %v4539_v3 = vadd.f32 %v4503_v36, %v4351_v52  ;;  %v3553_v43 = vpop.f32.mrb[29].mxu0 }
 0x22c   : > { %v4540_v33 = vadd.f32 %v3553_v43, %v2039_v45  ;;  %v4504_v61 = vpop.f32.mrb[30].mxu0 }
 0x22d   : > { %v3657_v1 = vadd.f32 %v4539_v3, %v5750_v49  ;;  %v4541_v51 = vadd.f32 %v4504_v61, %v4352_v23  ;;  %v3556_v62 = vpop.f32.mrb[31].mxu0 }
 0x22e   : > { %v3655_v16 = vadd.f32 %v4540_v33, %v5750_v49  ;;  %v4542_v14 = vadd.f32 %v3556_v62, %v2042_v53 }
 0x22f   : > { %3693 = vst [vmem:[%s5755_s18 + $0xf0] sm:$0xff] %v3657_v1  ;;  %v3658_v63 = vadd.f32 %v4541_v51, %v5750_v49 }
 0x230   : > { %3691 = vst [vmem:[%s5755_s18 + $0xe0] sm:$0xff] %v3655_v16  ;;  %v3656_v57 = vadd.f32 %v4542_v14, %v5750_v49 }
 0x231   : > { %3694 = vst [vmem:[%s5755_s18 + $0xf8] sm:$0xff] %v3658_v63 }
 0x232   : > { %3692 = vst [vmem:[%s5755_s18 + $0xe8] sm:$0xff] %v3656_v57  ;;  %v4507_v9 = vpop.f32.mrb[32].mxu0 }
 0x233   : > { %v4543_v17 = vadd.f32 %v4507_v9, %v4355_v21  ;;  %v3569_v48 = vpop.f32.mrb[33].mxu0 }
 0x234   : > { %v4544_v60 = vadd.f32 %v3569_v48, %v2055_v40  ;;  %v4508_v24 = vpop.f32.mrb[34].mxu0 }
 0x235   : > { %v3661_v54 = vadd.f32 %v4543_v17, %v5750_v49  ;;  %v4545_v31 = vadd.f32 %v4508_v24, %v4356_v39  ;;  %v3572_v56 = vpop.f32.mrb[35].mxu0 }
 0x236   : > { %v3659_v0 = vadd.f32 %v4544_v60, %v5750_v49  ;;  %v4546_v13 = vadd.f32 %v3572_v56, %v2058_v19 }
 0x237   : > { %3697 = vst [vmem:[%s5755_s18 + $0x110] sm:$0xff] %v3661_v54  ;;  %v3662_v38 = vadd.f32 %v4545_v31, %v5750_v49 }
 0x238   : > { %3695 = vst [vmem:[%s5755_s18 + $0x100] sm:$0xff] %v3659_v0  ;;  %v3660_v7 = vadd.f32 %v4546_v13, %v5750_v49 }
 0x239   : > { %3698 = vst [vmem:[%s5755_s18 + $0x118] sm:$0xff] %v3662_v38 }
 0x23a   : > { %3696 = vst [vmem:[%s5755_s18 + $0x108] sm:$0xff] %v3660_v7 }
 0x23b PF: > { %s13_s12 = sadd.s32 1, %s4898_s12  }
 0x23c   : > { %p10_p4 = scmp.ge.s32.totalorder %s13_s12, 4  }
 0x23e   :  { %12 = sbr.rel (!%p10_p4) target bundleno = 1 (0x1), region = 70 }

// kernel: resconv2d_forward.1
= control target key start
LH: loop header
LB: loop body
LE: loop exit
PB: predicated region body
PF: predicated region fallthrough
CT: control target
= control target key end

     0   :  { %s1712_s1 = inlined_call_operand.vmem [shape: bf16[128,128], index: 1, kind: input, shape index: {}]   ;;  %s1713_s0 = inlined_call_operand.vmem [shape: bf16[512,128], index: 0, kind: input, shape index: {}]   ;;  %s1714_s2 = inlined_call_operand.vmem [shape: f32[1,128], index: 2, kind: input, shape index: {}]   ;;  %s1715_s3 = inlined_call_operand.vmem [shape: f32[512,128], index: 3, kind: output, shape index: {}]  }
   0x1   :  { %v1271_v0 = vld [vmem:[%s1712_s1] sm:$0xff]   ;;  %v1272_v1 = vld [vmem:[%s1712_s1 + $0x8] sm:$0xff]   ;;  %v1273_v2 = vld [vmem:[%s1712_s1 + $0x10] sm:$0xff]  }
   0x2   :  { %1175 = vmatprep.subr.bf16.mxu0 %v1271_v0  ;;  %1255 = vmatprep.subr.bf16.mxu1 %v1271_v0  ;;  %v1274_v3 = vld [vmem:[%s1712_s1 + $0x18] sm:$0xff]   ;;  %v1279_v4 = vld [vmem:[%s1713_s0] sm:$0xff]   ;;  %v1276_v7 = vld [vmem:[%s1712_s1 + $0x28] sm:$0xff]  }
   0x3   :  { %1176 = vmatpush3.bf16.msra.mxu0 %v1271_v0  ;;  %1263 = vmatpush3.bf16.msra.mxu1 %v1271_v0  ;;  %v1280_v5 = vld [vmem:[%s1713_s0 + $0x80] sm:$0xff]   ;;  %v1277_v8 = vld [vmem:[%s1712_s1 + $0x30] sm:$0xff]   ;;  %v1278_v9 = vld [vmem:[%s1712_s1 + $0x38] sm:$0xff]  }
   0x4   :  { %1177 = vmatprep.subr.bf16.mxu0 %v1272_v1  ;;  %1256 = vmatprep.subr.bf16.mxu1 %v1272_v1  ;;  %v1275_v6 = vld [vmem:[%s1712_s1 + $0x20] sm:$0xff]   ;;  %v1281_v10 = vld [vmem:[%s1713_s0 + $0x8] sm:$0xff]   ;;  %v1283_v12 = vld [vmem:[%s1713_s0 + $0x10] sm:$0xff]  }
   0x5   :  { %1191 = vmatprep.mubr.bf16.mxu0 %v1279_v4  ;;  %1223 = vmatprep.mubr.bf16.mxu1 %v1280_v5  ;;  %v1282_v11 = vld [vmem:[%s1713_s0 + $0x88] sm:$0xff]   ;;  %v1284_v13 = vld [vmem:[%s1713_s0 + $0x90] sm:$0xff]   ;;  %v1285_v14 = vld [vmem:[%s1713_s0 + $0x18] sm:$0xff]  }
   0x6   :  { %v1286_v15 = vld [vmem:[%s1713_s0 + $0x98] sm:$0xff]   ;;  %v1287_v16 = vld [vmem:[%s1713_s0 + $0x20] sm:$0xff]   ;;  %v1289_v18 = vld [vmem:[%s1713_s0 + $0x28] sm:$0xff]  }
   0x7   :  { %1178 = vmatpush3.bf16.msra.mxu0 %v1272_v1  ;;  %1264 = vmatpush3.bf16.msra.mxu1 %v1272_v1  ;;  %v1288_v17 = vld [vmem:[%s1713_s0 + $0xa0] sm:$0xff]   ;;  %v1290_v19 = vld [vmem:[%s1713_s0 + $0xa8] sm:$0xff]   ;;  %v1291_v20 = vld [vmem:[%s1713_s0 + $0x30] sm:$0xff]  }
   0x8   :  { %1179 = vmatprep.subr.bf16.mxu0 %v1273_v2  ;;  %1257 = vmatprep.subr.bf16.mxu1 %v1273_v2  ;;  %v1292_v21 = vld [vmem:[%s1713_s0 + $0xb0] sm:$0xff]   ;;  %v1293_v22 = vld [vmem:[%s1713_s0 + $0x38] sm:$0xff]   ;;  %v1295_v24 = vld [vmem:[%s1713_s0 + $0x40] sm:$0xff]  }
   0x9   :  { %v1294_v23 = vld [vmem:[%s1713_s0 + $0xb8] sm:$0xff]   ;;  %v1296_v25 = vld [vmem:[%s1713_s0 + $0xc0] sm:$0xff]   ;;  %v1297_v26 = vld [vmem:[%s1713_s0 + $0x48] sm:$0xff]  }
   0xa   :  { %v1298_v27 = vld [vmem:[%s1713_s0 + $0xc8] sm:$0xff]   ;;  %v1299_v28 = vld [vmem:[%s1713_s0 + $0x50] sm:$0xff]   ;;  %v1301_v30 = vld [vmem:[%s1713_s0 + $0x58] sm:$0xff]  }
   0xb   :  { %1180 = vmatpush3.bf16.msra.mxu0 %v1273_v2  ;;  %1265 = vmatpush3.bf16.msra.mxu1 %v1273_v2  ;;  %v1300_v29 = vld [vmem:[%s1713_s0 + $0xd0] sm:$0xff]   ;;  %v1302_v31 = vld [vmem:[%s1713_s0 + $0xd8] sm:$0xff]   ;;  %v1303_v32 = vld [vmem:[%s1713_s0 + $0x60] sm:$0xff]  }
   0xc   :  { %1181 = vmatprep.subr.bf16.mxu0 %v1274_v3  ;;  %1258 = vmatprep.subr.bf16.mxu1 %v1274_v3  ;;  %v1304_v33 = vld [vmem:[%s1713_s0 + $0xe0] sm:$0xff]   ;;  %v1305_v34 = vld [vmem:[%s1713_s0 + $0x68] sm:$0xff]   ;;  %v1307_v36 = vld [vmem:[%s1713_s0 + $0x70] sm:$0xff]  }
   0xd   :  { %v1306_v35 = vld [vmem:[%s1713_s0 + $0xe8] sm:$0xff]   ;;  %v1308_v37 = vld [vmem:[%s1713_s0 + $0xf0] sm:$0xff]   ;;  %v1309_v38 = vld [vmem:[%s1713_s0 + $0x78] sm:$0xff]  }
   0xe   :  { %v1310_v39 = vld [vmem:[%s1713_s0 + $0xf8] sm:$0xff]   ;;  %v1454_v40 = vld [vmem:[%s1714_s2] ss:$0 sm:$0xff] }
   0xf   :  { %1182 = vmatpush3.bf16.msra.mxu0 %v1274_v3  ;;  %1266 = vmatpush3.bf16.msra.mxu1 %v1274_v3 }
  0x10   :  { %1183 = vmatprep.subr.bf16.mxu0 %v1275_v6  ;;  %1259 = vmatprep.subr.bf16.mxu1 %v1275_v6 }
  0x13   :  { %1184 = vmatpush3.bf16.msra.mxu0 %v1275_v6  ;;  %1267 = vmatpush3.bf16.msra.mxu1 %v1275_v6 }
  0x14   :  { %1185 = vmatprep.subr.bf16.mxu0 %v1276_v7  ;;  %1260 = vmatprep.subr.bf16.mxu1 %v1276_v7 }
  0x17   :  { %1186 = vmatpush3.bf16.msra.mxu0 %v1276_v7  ;;  %1268 = vmatpush3.bf16.msra.mxu1 %v1276_v7 }
  0x18   :  { %1187 = vmatprep.subr.bf16.mxu0 %v1277_v8  ;;  %1261 = vmatprep.subr.bf16.mxu1 %v1277_v8 }
  0x1b   :  { %1188 = vmatpush3.bf16.msra.mxu0 %v1277_v8  ;;  %1269 = vmatpush3.bf16.msra.mxu1 %v1277_v8 }
  0x1c   :  { %1189 = vmatprep.subr.bf16.mxu0 %v1278_v9  ;;  %1262 = vmatprep.subr.bf16.mxu1 %v1278_v9 }
  0x1f   :  { %1190 = vmatpush3.bf16.msra.mxu0 %v1278_v9  ;;  %1270 = vmatpush3.bf16.msra.mxu1 %v1278_v9 }
  0x22   :  { %1192 = vmatmul.mubr.bf16.vlgmr.msra.gmra.mrb[0].mxu0 %v1281_v10  ;;  %1224 = vmatmul.mubr.bf16.vlgmr.msra.gmra.mrb[0].mxu1 %v1282_v11 }
  0x23   :  { %1195 = vmatprep.mubr.bf16.mxu0 %v1283_v12  ;;  %1227 = vmatprep.mubr.bf16.mxu1 %v1284_v13 }
  0x2a   :  { %1196 = vmatmul.mubr.bf16.gmra.mrb[4].mxu0 %v1285_v14  ;;  %1228 = vmatmul.mubr.bf16.gmra.mrb[4].mxu1 %v1286_v15 }
  0x2b   :  { %1199 = vmatprep.mubr.bf16.mxu0 %v1287_v16  ;;  %1231 = vmatprep.mubr.bf16.mxu1 %v1288_v17 }
  0x32   :  { %1200 = vmatmul.mubr.bf16.gmra.mrb[8].mxu0 %v1289_v18  ;;  %1232 = vmatmul.mubr.bf16.gmra.mrb[8].mxu1 %v1290_v19 }
  0x33   :  { %1203 = vmatprep.mubr.bf16.mxu0 %v1291_v20  ;;  %1235 = vmatprep.mubr.bf16.mxu1 %v1292_v21 }
  0x3a   :  { %1204 = vmatmul.mubr.bf16.gmra.mrb[12].mxu0 %v1293_v22  ;;  %1236 = vmatmul.mubr.bf16.gmra.mrb[12].mxu1 %v1294_v23 }
  0x3b   :  { %1207 = vmatprep.mubr.bf16.mxu0 %v1295_v24  ;;  %1239 = vmatprep.mubr.bf16.mxu1 %v1296_v25 }
  0x42   :  { %1208 = vmatmul.mubr.bf16.gmra.mrb[16].mxu0 %v1297_v26  ;;  %1240 = vmatmul.mubr.bf16.gmra.mrb[16].mxu1 %v1298_v27 }
  0x43   :  { %1211 = vmatprep.mubr.bf16.mxu0 %v1299_v28  ;;  %1243 = vmatprep.mubr.bf16.mxu1 %v1300_v29 }
  0x4a   :  { %1212 = vmatmul.mubr.bf16.gmra.mrb[20].mxu0 %v1301_v30  ;;  %1244 = vmatmul.mubr.bf16.gmra.mrb[20].mxu1 %v1302_v31 }
  0x4b   :  { %1215 = vmatprep.mubr.bf16.mxu0 %v1303_v32  ;;  %1247 = vmatprep.mubr.bf16.mxu1 %v1304_v33 }
  0x52   :  { %1216 = vmatmul.mubr.bf16.gmra.mrb[24].mxu0 %v1305_v34  ;;  %1248 = vmatmul.mubr.bf16.gmra.mrb[24].mxu1 %v1306_v35 }
  0x53   :  { %1219 = vmatprep.mubr.bf16.mxu0 %v1307_v36  ;;  %1251 = vmatprep.mubr.bf16.mxu1 %v1308_v37 }
  0x5a   :  { %1220 = vmatmul.mubr.bf16.gmra.mrb[28].mxu0 %v1309_v38  ;;  %1252 = vmatmul.mubr.bf16.gmra.mrb[28].mxu1 %v1310_v39 }
  0xf5   :  { %v1193_v41 = vpop.f32.mrb[0].mxu0  ;;  %v1225_v42 = vpop.f32.mrb[0].mxu1 }
  0xf6   :  { %v964_v43 = vadd.f32 %v1193_v41, %v1454_v40  ;;  %v996_v44 = vadd.f32 %v1225_v42, %v1454_v40  ;;  %v369_v45 = vpop.f32.mrb[1].mxu0  ;;  %v497_v46 = vpop.f32.mrb[1].mxu1 }
  0xf7   :  { %v962_v47 = vadd.f32 %v1454_v40, %v369_v45  ;;  %v994_v48 = vadd.f32 %v1454_v40, %v497_v46  ;;  %v1194_v49 = vpop.f32.mrb[2].mxu0  ;;  %v1226_v50 = vpop.f32.mrb[2].mxu1 }
  0xf8   :  { %1028 = vst [vmem:[%s1715_s3 + $0x10] sm:$0xff] %v964_v43  ;;  %1060 = vst [vmem:[%s1715_s3 + $0x110] sm:$0xff] %v996_v44  ;;  %v965_v51 = vadd.f32 %v1194_v49, %v1454_v40  ;;  %v997_v52 = vadd.f32 %v1226_v50, %v1454_v40  ;;  %v372_v53 = vpop.f32.mrb[3].mxu0  ;;  %v500_v54 = vpop.f32.mrb[3].mxu1 }
  0xf9   :  { %1026 = vst [vmem:[%s1715_s3] sm:$0xff] %v962_v47  ;;  %1058 = vst [vmem:[%s1715_s3 + $0x100] sm:$0xff] %v994_v48  ;;  %v963_v55 = vadd.f32 %v1454_v40, %v372_v53  ;;  %v995_v56 = vadd.f32 %v1454_v40, %v500_v54 }
  0xfa   :  { %1029 = vst [vmem:[%s1715_s3 + $0x18] sm:$0xff] %v965_v51  ;;  %1061 = vst [vmem:[%s1715_s3 + $0x118] sm:$0xff] %v997_v52 }
  0xfb   :  { %1027 = vst [vmem:[%s1715_s3 + $0x8] sm:$0xff] %v963_v55  ;;  %1059 = vst [vmem:[%s1715_s3 + $0x108] sm:$0xff] %v995_v56 }
  0xfd   :  { %v1197_v57 = vpop.f32.mrb[4].mxu0  ;;  %v1229_v58 = vpop.f32.mrb[4].mxu1 }
  0xfe   :  { %v968_v59 = vadd.f32 %v1197_v57, %v1454_v40  ;;  %v1000_v60 = vadd.f32 %v1229_v58, %v1454_v40  ;;  %v385_v61 = vpop.f32.mrb[5].mxu0  ;;  %v513_v62 = vpop.f32.mrb[5].mxu1 }
  0xff   :  { %v966_v63 = vadd.f32 %v1454_v40, %v385_v61  ;;  %v998_v0 = vadd.f32 %v1454_v40, %v513_v62  ;;  %v1198_v1 = vpop.f32.mrb[6].mxu0  ;;  %v1230_v2 = vpop.f32.mrb[6].mxu1 }
 0x100   :  { %1032 = vst [vmem:[%s1715_s3 + $0x30] sm:$0xff] %v968_v59  ;;  %1064 = vst [vmem:[%s1715_s3 + $0x130] sm:$0xff] %v1000_v60  ;;  %v969_v3 = vadd.f32 %v1198_v1, %v1454_v40  ;;  %v1001_v4 = vadd.f32 %v1230_v2, %v1454_v40  ;;  %v388_v5 = vpop.f32.mrb[7].mxu0  ;;  %v516_v6 = vpop.f32.mrb[7].mxu1 }
 0x101   :  { %1030 = vst [vmem:[%s1715_s3 + $0x20] sm:$0xff] %v966_v63  ;;  %1062 = vst [vmem:[%s1715_s3 + $0x120] sm:$0xff] %v998_v0  ;;  %v967_v7 = vadd.f32 %v1454_v40, %v388_v5  ;;  %v999_v8 = vadd.f32 %v1454_v40, %v516_v6 }
 0x102   :  { %1033 = vst [vmem:[%s1715_s3 + $0x38] sm:$0xff] %v969_v3  ;;  %1065 = vst [vmem:[%s1715_s3 + $0x138] sm:$0xff] %v1001_v4 }
 0x103   :  { %1031 = vst [vmem:[%s1715_s3 + $0x28] sm:$0xff] %v967_v7  ;;  %1063 = vst [vmem:[%s1715_s3 + $0x128] sm:$0xff] %v999_v8 }
 0x105   :  { %v1201_v9 = vpop.f32.mrb[8].mxu0  ;;  %v1233_v10 = vpop.f32.mrb[8].mxu1 }
 0x106   :  { %v972_v11 = vadd.f32 %v1201_v9, %v1454_v40  ;;  %v1004_v12 = vadd.f32 %v1233_v10, %v1454_v40  ;;  %v401_v13 = vpop.f32.mrb[9].mxu0  ;;  %v529_v14 = vpop.f32.mrb[9].mxu1 }
 0x107   :  { %v970_v15 = vadd.f32 %v1454_v40, %v401_v13  ;;  %v1002_v16 = vadd.f32 %v1454_v40, %v529_v14  ;;  %v1202_v17 = vpop.f32.mrb[10].mxu0  ;;  %v1234_v18 = vpop.f32.mrb[10].mxu1 }
 0x108   :  { %1036 = vst [vmem:[%s1715_s3 + $0x50] sm:$0xff] %v972_v11  ;;  %1068 = vst [vmem:[%s1715_s3 + $0x150] sm:$0xff] %v1004_v12  ;;  %v973_v19 = vadd.f32 %v1202_v17, %v1454_v40  ;;  %v1005_v20 = vadd.f32 %v1234_v18, %v1454_v40  ;;  %v404_v21 = vpop.f32.mrb[11].mxu0  ;;  %v532_v22 = vpop.f32.mrb[11].mxu1 }
 0x109   :  { %1034 = vst [vmem:[%s1715_s3 + $0x40] sm:$0xff] %v970_v15  ;;  %1066 = vst [vmem:[%s1715_s3 + $0x140] sm:$0xff] %v1002_v16  ;;  %v971_v23 = vadd.f32 %v1454_v40, %v404_v21  ;;  %v1003_v24 = vadd.f32 %v1454_v40, %v532_v22 }
 0x10a   :  { %1037 = vst [vmem:[%s1715_s3 + $0x58] sm:$0xff] %v973_v19  ;;  %1069 = vst [vmem:[%s1715_s3 + $0x158] sm:$0xff] %v1005_v20 }
 0x10b   :  { %1035 = vst [vmem:[%s1715_s3 + $0x48] sm:$0xff] %v971_v23  ;;  %1067 = vst [vmem:[%s1715_s3 + $0x148] sm:$0xff] %v1003_v24 }
 0x10d   :  { %v1205_v25 = vpop.f32.mrb[12].mxu0  ;;  %v1237_v26 = vpop.f32.mrb[12].mxu1 }
 0x10e   :  { %v976_v27 = vadd.f32 %v1205_v25, %v1454_v40  ;;  %v1008_v28 = vadd.f32 %v1237_v26, %v1454_v40  ;;  %v417_v29 = vpop.f32.mrb[13].mxu0  ;;  %v545_v30 = vpop.f32.mrb[13].mxu1 }
 0x10f   :  { %v974_v31 = vadd.f32 %v1454_v40, %v417_v29  ;;  %v1006_v32 = vadd.f32 %v1454_v40, %v545_v30  ;;  %v1206_v33 = vpop.f32.mrb[14].mxu0  ;;  %v1238_v34 = vpop.f32.mrb[14].mxu1 }
 0x110   :  { %1040 = vst [vmem:[%s1715_s3 + $0x70] sm:$0xff] %v976_v27  ;;  %1072 = vst [vmem:[%s1715_s3 + $0x170] sm:$0xff] %v1008_v28  ;;  %v977_v35 = vadd.f32 %v1206_v33, %v1454_v40  ;;  %v1009_v36 = vadd.f32 %v1238_v34, %v1454_v40  ;;  %v420_v37 = vpop.f32.mrb[15].mxu0  ;;  %v548_v38 = vpop.f32.mrb[15].mxu1 }
 0x111   :  { %1038 = vst [vmem:[%s1715_s3 + $0x60] sm:$0xff] %v974_v31  ;;  %1070 = vst [vmem:[%s1715_s3 + $0x160] sm:$0xff] %v1006_v32  ;;  %v975_v39 = vadd.f32 %v1454_v40, %v420_v37  ;;  %v1007_v41 = vadd.f32 %v1454_v40, %v548_v38 }
 0x112   :  { %1041 = vst [vmem:[%s1715_s3 + $0x78] sm:$0xff] %v977_v35  ;;  %1073 = vst [vmem:[%s1715_s3 + $0x178] sm:$0xff] %v1009_v36 }
 0x113   :  { %1039 = vst [vmem:[%s1715_s3 + $0x68] sm:$0xff] %v975_v39  ;;  %1071 = vst [vmem:[%s1715_s3 + $0x168] sm:$0xff] %v1007_v41 }
 0x115   :  { %v1209_v42 = vpop.f32.mrb[16].mxu0  ;;  %v1241_v43 = vpop.f32.mrb[16].mxu1 }
 0x116   :  { %v980_v44 = vadd.f32 %v1209_v42, %v1454_v40  ;;  %v1012_v45 = vadd.f32 %v1241_v43, %v1454_v40  ;;  %v433_v46 = vpop.f32.mrb[17].mxu0  ;;  %v561_v47 = vpop.f32.mrb[17].mxu1 }
 0x117   :  { %v978_v48 = vadd.f32 %v1454_v40, %v433_v46  ;;  %v1010_v49 = vadd.f32 %v1454_v40, %v561_v47  ;;  %v1210_v50 = vpop.f32.mrb[18].mxu0  ;;  %v1242_v51 = vpop.f32.mrb[18].mxu1 }
 0x118   :  { %1044 = vst [vmem:[%s1715_s3 + $0x90] sm:$0xff] %v980_v44  ;;  %1076 = vst [vmem:[%s1715_s3 + $0x190] sm:$0xff] %v1012_v45  ;;  %v981_v52 = vadd.f32 %v1210_v50, %v1454_v40  ;;  %v1013_v53 = vadd.f32 %v1242_v51, %v1454_v40  ;;  %v436_v54 = vpop.f32.mrb[19].mxu0  ;;  %v564_v55 = vpop.f32.mrb[19].mxu1 }
 0x119   :  { %1042 = vst [vmem:[%s1715_s3 + $0x80] sm:$0xff] %v978_v48  ;;  %1074 = vst [vmem:[%s1715_s3 + $0x180] sm:$0xff] %v1010_v49  ;;  %v979_v56 = vadd.f32 %v1454_v40, %v436_v54  ;;  %v1011_v57 = vadd.f32 %v1454_v40, %v564_v55 }
 0x11a   :  { %1045 = vst [vmem:[%s1715_s3 + $0x98] sm:$0xff] %v981_v52  ;;  %1077 = vst [vmem:[%s1715_s3 + $0x198] sm:$0xff] %v1013_v53 }
 0x11b   :  { %1043 = vst [vmem:[%s1715_s3 + $0x88] sm:$0xff] %v979_v56  ;;  %1075 = vst [vmem:[%s1715_s3 + $0x188] sm:$0xff] %v1011_v57 }
 0x11d   :  { %v1213_v58 = vpop.f32.mrb[20].mxu0  ;;  %v1245_v59 = vpop.f32.mrb[20].mxu1 }
 0x11e   :  { %v984_v60 = vadd.f32 %v1213_v58, %v1454_v40  ;;  %v1016_v61 = vadd.f32 %v1245_v59, %v1454_v40  ;;  %v449_v62 = vpop.f32.mrb[21].mxu0  ;;  %v577_v63 = vpop.f32.mrb[21].mxu1 }
 0x11f   :  { %v982_v0 = vadd.f32 %v1454_v40, %v449_v62  ;;  %v1014_v1 = vadd.f32 %v1454_v40, %v577_v63  ;;  %v1214_v2 = vpop.f32.mrb[22].mxu0  ;;  %v1246_v3 = vpop.f32.mrb[22].mxu1 }
 0x120   :  { %1048 = vst [vmem:[%s1715_s3 + $0xb0] sm:$0xff] %v984_v60  ;;  %1080 = vst [vmem:[%s1715_s3 + $0x1b0] sm:$0xff] %v1016_v61  ;;  %v985_v4 = vadd.f32 %v1214_v2, %v1454_v40  ;;  %v1017_v5 = vadd.f32 %v1246_v3, %v1454_v40  ;;  %v452_v6 = vpop.f32.mrb[23].mxu0  ;;  %v580_v7 = vpop.f32.mrb[23].mxu1 }
 0x121   :  { %1046 = vst [vmem:[%s1715_s3 + $0xa0] sm:$0xff] %v982_v0  ;;  %1078 = vst [vmem:[%s1715_s3 + $0x1a0] sm:$0xff] %v1014_v1  ;;  %v983_v8 = vadd.f32 %v1454_v40, %v452_v6  ;;  %v1015_v9 = vadd.f32 %v1454_v40, %v580_v7 }
 0x122   :  { %1049 = vst [vmem:[%s1715_s3 + $0xb8] sm:$0xff] %v985_v4  ;;  %1081 = vst [vmem:[%s1715_s3 + $0x1b8] sm:$0xff] %v1017_v5 }
 0x123   :  { %1047 = vst [vmem:[%s1715_s3 + $0xa8] sm:$0xff] %v983_v8  ;;  %1079 = vst [vmem:[%s1715_s3 + $0x1a8] sm:$0xff] %v1015_v9 }
 0x125   :  { %v1217_v10 = vpop.f32.mrb[24].mxu0  ;;  %v1249_v11 = vpop.f32.mrb[24].mxu1 }
 0x126   :  { %v988_v12 = vadd.f32 %v1217_v10, %v1454_v40  ;;  %v1020_v13 = vadd.f32 %v1249_v11, %v1454_v40  ;;  %v465_v14 = vpop.f32.mrb[25].mxu0  ;;  %v593_v15 = vpop.f32.mrb[25].mxu1 }
 0x127   :  { %v986_v16 = vadd.f32 %v1454_v40, %v465_v14  ;;  %v1018_v17 = vadd.f32 %v1454_v40, %v593_v15  ;;  %v1218_v18 = vpop.f32.mrb[26].mxu0  ;;  %v1250_v19 = vpop.f32.mrb[26].mxu1 }
 0x128   :  { %1052 = vst [vmem:[%s1715_s3 + $0xd0] sm:$0xff] %v988_v12  ;;  %1084 = vst [vmem:[%s1715_s3 + $0x1d0] sm:$0xff] %v1020_v13  ;;  %v989_v20 = vadd.f32 %v1218_v18, %v1454_v40  ;;  %v1021_v21 = vadd.f32 %v1250_v19, %v1454_v40  ;;  %v468_v22 = vpop.f32.mrb[27].mxu0  ;;  %v596_v23 = vpop.f32.mrb[27].mxu1 }
 0x129   :  { %1050 = vst [vmem:[%s1715_s3 + $0xc0] sm:$0xff] %v986_v16  ;;  %1082 = vst [vmem:[%s1715_s3 + $0x1c0] sm:$0xff] %v1018_v17  ;;  %v987_v24 = vadd.f32 %v1454_v40, %v468_v22  ;;  %v1019_v25 = vadd.f32 %v1454_v40, %v596_v23 }
 0x12a   :  { %1053 = vst [vmem:[%s1715_s3 + $0xd8] sm:$0xff] %v989_v20  ;;  %1085 = vst [vmem:[%s1715_s3 + $0x1d8] sm:$0xff] %v1021_v21 }
 0x12b   :  { %1051 = vst [vmem:[%s1715_s3 + $0xc8] sm:$0xff] %v987_v24  ;;  %1083 = vst [vmem:[%s1715_s3 + $0x1c8] sm:$0xff] %v1019_v25 }
 0x12d   :  { %v1221_v26 = vpop.f32.mrb[28].mxu0  ;;  %v1253_v27 = vpop.f32.mrb[28].mxu1 }
 0x12e   :  { %v992_v28 = vadd.f32 %v1221_v26, %v1454_v40  ;;  %v1024_v29 = vadd.f32 %v1253_v27, %v1454_v40  ;;  %v481_v30 = vpop.f32.mrb[29].mxu0  ;;  %v609_v31 = vpop.f32.mrb[29].mxu1 }
 0x12f   :  { %v990_v32 = vadd.f32 %v1454_v40, %v481_v30  ;;  %v1022_v33 = vadd.f32 %v1454_v40, %v609_v31  ;;  %v1222_v34 = vpop.f32.mrb[30].mxu0  ;;  %v1254_v35 = vpop.f32.mrb[30].mxu1 }
 0x130   :  { %1056 = vst [vmem:[%s1715_s3 + $0xf0] sm:$0xff] %v992_v28  ;;  %1088 = vst [vmem:[%s1715_s3 + $0x1f0] sm:$0xff] %v1024_v29  ;;  %v993_v36 = vadd.f32 %v1222_v34, %v1454_v40  ;;  %v1025_v37 = vadd.f32 %v1254_v35, %v1454_v40  ;;  %v484_v38 = vpop.f32.mrb[31].mxu0  ;;  %v612_v39 = vpop.f32.mrb[31].mxu1 }
 0x131   :  { %1054 = vst [vmem:[%s1715_s3 + $0xe0] sm:$0xff] %v990_v32  ;;  %1086 = vst [vmem:[%s1715_s3 + $0x1e0] sm:$0xff] %v1022_v33  ;;  %v991_v41 = vadd.f32 %v1454_v40, %v484_v38  ;;  %v1023_v42 = vadd.f32 %v1454_v40, %v612_v39 }
 0x132   :  { %1057 = vst [vmem:[%s1715_s3 + $0xf8] sm:$0xff] %v993_v36  ;;  %1089 = vst [vmem:[%s1715_s3 + $0x1f8] sm:$0xff] %v1025_v37 }
 0x133   :  { %1055 = vst [vmem:[%s1715_s3 + $0xe8] sm:$0xff] %v991_v41  ;;  %1087 = vst [vmem:[%s1715_s3 + $0x1e8] sm:$0xff] %v1023_v42 }

</bundles_post_ra>
